<compile_context>
chip_gen: v7x
topology: tpu7x:2x2x1
jax: 0.10.0
libtpu: 0.0.40
codegen_flags: <defaults>
</compile_context>

<pallas_src>
import math
import functools

import numpy as np
import jax
import jax.numpy as jnp
from jax import lax
from jax.experimental import pallas as pl
from jax.experimental.pallas import tpu as pltpu


def clip_layer_kernel(x_ref, bias_ref, ln1_g_ref, ln1_b_ref, wqkv_ref, bqkv_ref,
                      wo_ref, bo_ref, ln2_g_ref, ln2_b_ref,
                      w1_ref, b1_ref, w2_ref, b2_ref,
                      out_ref, *, n_head, d_head, head_group, eps):
    xb = x_ref[...]                      # (Bb, S, D) f32
    Bb, S, D = xb.shape
    x = xb.reshape(Bb * S, D)            # S % 8 == 0 (wrapper pads) -> cheap reshape

    def layernorm(v, g, b):
        mu = jnp.mean(v, axis=-1, keepdims=True)
        var = jnp.mean((v - mu) ** 2, axis=-1, keepdims=True)
        return (v - mu) * lax.rsqrt(var + eps) * g + b

    def mm(a_f32, w_bf16):
        # bf16 MXU inputs, f32 accumulation.
        return jnp.dot(a_f32.astype(jnp.bfloat16), w_bf16,
                       preferred_element_type=jnp.float32)

    # ---- block 1: LN -> causal self-attention -> residual ----
    h = layernorm(x, ln1_g_ref[...], ln1_b_ref[...])
    qkv = mm(h, wqkv_ref[...]) + bqkv_ref[...]           # (Bb*S, 3D) f32
    qkv3 = qkv.reshape(Bb, S, 3 * D)

    scale = 1.0 / math.sqrt(d_head)
    bias = bias_ref[...]                                 # (S, S) additive causal bias

    dn = (((1,), (1,)), ((), ()))        # contract last dim of q and k (no transpose)
    hg = head_group                      # heads per output-projection group (2 if possible)
    gw = hg * d_head                     # group lane width (128 when d_head == 64)
    n_groups = n_head // hg

    attn_items = []
    for b in range(Bb):                  # static loop: per-item (S,S) softmax core
        qb = qkv3[b, :, 0 * D:1 * D] * scale   # fold 1/sqrt(dh) into q
        kb = qkv3[b, :, 1 * D:2 * D]
        vb = qkv3[b, :, 2 * D:3 * D]
        acc = jnp.zeros((S, D), jnp.float32)
        for g in range(n_groups):        # static loop over head groups
            lo = g * gw
            # 128-lane-aligned group slice, split per-head in-register.
            qg = qb[:, lo:lo + gw].astype(jnp.bfloat16)
            kg = kb[:, lo:lo + gw].astype(jnp.bfloat16)
            vg = vb[:, lo:lo + gw].astype(jnp.bfloat16)
            outs = []
            for hh in range(hg):
                s0 = hh * d_head
                qh = qg[:, s0:s0 + d_head]
                kh = kg[:, s0:s0 + d_head]
                vh = vg[:, s0:s0 + d_head]
                scores = lax.dot_general(qh, kh, dn,
                                         preferred_element_type=jnp.float32)
                scores = scores + bias
                scores = scores - jnp.max(scores, axis=-1, keepdims=True)
                p = jnp.exp(scores)
                inv = pl.reciprocal(jnp.sum(p, axis=-1, keepdims=True), approx=True)
                outs.append(jnp.dot((p * inv).astype(jnp.bfloat16), vh,
                                    preferred_element_type=jnp.float32))
            go = outs[0] if hg == 1 else jnp.concatenate(outs, axis=-1)  # (S, gw)
            # accumulate through this group's slab of the output projection
            acc = acc + jnp.dot(go.astype(jnp.bfloat16), wo_ref[g],
                                preferred_element_type=jnp.float32)
        attn_items.append(acc)

    attn = attn_items[0] if Bb == 1 else jnp.concatenate(attn_items, axis=0)
    x2 = attn + bo_ref[...] + x                           # residual 1, (Bb*S, D)

    # ---- block 2: LN -> Linear -> QuickGELU -> Linear -> residual ----
    h2 = layernorm(x2, ln2_g_ref[...], ln2_b_ref[...])
    h2 = mm(h2, w1_ref[...]) + b1_ref[...]
    h2 = h2 * jax.nn.sigmoid(1.702 * h2)                  # QuickGELU (f32 VPU/EUP)
    h2 = mm(h2, w2_ref[...]) + b2_ref[...]
    out_ref[...] = (h2 + x2).reshape(Bb, S, D)


def prepare_params(params, n_head):
    """One-time weight prep (call at model init, NOT per forward):
    bf16 cast of MXU-feeding weights + head-grouped reshape of Wo."""
    D = params["wqkv"].shape[0]
    d_head = D // n_head
    # pair heads when that gives a wider (<=128-lane aligned) contraction
    hg = 2 if (n_head % 2 == 0 and d_head < 128) else 1
    prepped = dict(params)
    prepped["wqkv"] = params["wqkv"].astype(jnp.bfloat16)                        # (D, 3D)
    prepped["wo"] = params["wo"].astype(jnp.bfloat16).reshape(
        n_head // hg, hg * d_head, D)                                            # (G, hg*dh, D)
    prepped["w1"] = params["w1"].astype(jnp.bfloat16)                            # (D, 4D)
    prepped["w2"] = params["w2"].astype(jnp.bfloat16)                            # (4D, D)
    prepped["_head_group"] = hg
    return prepped


def clip_layer(x, prepped, n_head, *, block_b=None):
    """x: (B, S, D) float32. prepped: output of prepare_params()."""
    B, S, D = x.shape
    d_head = D // n_head
    hg = prepped["_head_group"]

    # Batch folding: block_b items per grid step (review: 4-8 on v5e/v6e, 2-4 on v7x).
    if block_b is None:
        block_b = min(B, 4)
    B_pad = ((B + block_b - 1) // block_b) * block_b
    # Pad S to a sublane multiple so in-kernel flatten/concat along rows is aligned.
    S_pad = ((S + 7) // 8) * 8
    xp = x
    if (B_pad != B) or (S_pad != S):
        xp = jnp.pad(x, ((0, B_pad - B), (0, S_pad - S), (0, 0)))

    # Resident additive causal bias (strict upper triangle -> -1e30), built once.
    row = lax.broadcasted_iota(jnp.int32, (S_pad, S_pad), 0)
    col = lax.broadcasted_iota(jnp.int32, (S_pad, S_pad), 1)
    causal_bias = jnp.where(col > row, jnp.float32(-1e30), jnp.float32(0.0))

    param_list = [
        causal_bias,
        prepped["ln1_g"], prepped["ln1_b"],
        prepped["wqkv"], prepped["bqkv"],
        prepped["wo"], prepped["bo"],
        prepped["ln2_g"], prepped["ln2_b"],
        prepped["w1"], prepped["b1"],
        prepped["w2"], prepped["b2"],
    ]

    def _resident_spec(p):
        zeros = (0,) * p.ndim
        # Constant index_map across the grid + single buffer -> one resident copy.
        return pl.BlockSpec(p.shape, lambda b, _z=zeros: _z,
                            pipeline_mode=pl.Buffered(1))

    param_specs = [_resident_spec(p) for p in param_list]

    x_spec = pl.BlockSpec((block_b, S_pad, D), lambda b: (b, 0, 0))
    out_spec = pl.BlockSpec((block_b, S_pad, D), lambda b: (b, 0, 0))

    kernel = functools.partial(
        clip_layer_kernel, n_head=n_head, d_head=d_head,
        head_group=hg, eps=1e-5)

    out = pl.pallas_call(
        kernel,
        out_shape=jax.ShapeDtypeStruct((B_pad, S_pad, D), jnp.float32),
        grid_spec=pltpu.PrefetchScalarGridSpec(
            num_scalar_prefetch=0,
            grid=(B_pad // block_b,),
            in_specs=[x_spec] + param_specs,
            out_specs=out_spec,
        ),
        compiler_params=pltpu.CompilerParams(
            dimension_semantics=("parallel",),
            # 48 MiB: leaves headroom on v7x's 64 MiB physical VMEM per TC and
            # is comfortably within v5e/v6e's 128 MiB.
            vmem_limit_bytes=48 * 1024 * 1024),
    )(xp, *param_list)

    if (B_pad != B) or (S_pad != S):
        out = out[:B, :S, :]
    return out


# ---------------- pure-JAX reference (mirrors the PyTorch forward) -----------
def ref_forward(x, p, n_head):
    B, S, D = x.shape
    dh = D // n_head

    def ln(v, g, b):
        mu = jnp.mean(v, axis=-1, keepdims=True)
        var = jnp.mean((v - mu) ** 2, axis=-1, keepdims=True)
        return (v - mu) / jnp.sqrt(var + 1e-5) * g + b

    residual = x
    h = ln(x, p["ln1_g"][0], p["ln1_b"][0])
    qkv = h @ p["wqkv"] + p["bqkv"][0]
    q, k, v = jnp.split(qkv, 3, axis=-1)
    q = q.reshape(B, S, n_head, dh).transpose(0, 2, 1, 3)
    k = k.reshape(B, S, n_head, dh).transpose(0, 2, 1, 3)
    v = v.reshape(B, S, n_head, dh).transpose(0, 2, 1, 3)
    w = jnp.einsum("bhqd,bhkd->bhqk", q, k)
    mask = jnp.triu(jnp.ones((S, S), dtype=bool), 1)
    w = jnp.where(mask, -jnp.inf, w) / math.sqrt(dh)
    w = jax.nn.softmax(w, axis=-1)
    o = jnp.einsum("bhqk,bhkd->bhqd", w, v).transpose(0, 2, 1, 3).reshape(B, S, D)
    o = o @ p["wo"] + p["bo"][0]
    x = o + residual
    residual = x
    h = ln(x, p["ln2_g"][0], p["ln2_b"][0])
    h = h @ p["w1"] + p["b1"][0]
    h = h * jax.nn.sigmoid(1.702 * h)
    h = h @ p["w2"] + p["b2"][0]
    return h + residual


def init_params(key, n_embed):
    ks = jax.random.split(key, 8)
    D = n_embed
    scale = 0.02
    # PyTorch Linear stores weight as (out, in); we pre-transpose to (in, out).
    w_inproj = jax.random.normal(ks[0], (3 * D, D), jnp.float32) * scale
    w_out = jax.random.normal(ks[1], (D, D), jnp.float32) * scale
    w1 = jax.random.normal(ks[2], (4 * D, D), jnp.float32) * scale
    w2 = jax.random.normal(ks[3], (D, 4 * D), jnp.float32) * scale
    return {
        "ln1_g": jnp.ones((1, D), jnp.float32),
        "ln1_b": jnp.zeros((1, D), jnp.float32),
        "wqkv": w_inproj.T,                                        # (D, 3D)
        "bqkv": (jax.random.normal(ks[4], (3 * D,)) * scale).reshape(1, 3 * D),
        "wo": w_out.T,                                             # (D, D)
        "bo": (jax.random.normal(ks[5], (D,)) * scale).reshape(1, D),
        "ln2_g": jnp.ones((1, D), jnp.float32),
        "ln2_b": jnp.zeros((1, D), jnp.float32),
        "w1": w1.T,                                                # (D, 4D)
        "b1": (jax.random.normal(ks[6], (4 * D,)) * scale).reshape(1, 4 * D),
        "w2": w2.T,                                                # (4D, D)
        "b2": (jax.random.normal(ks[7], (D,)) * scale).reshape(1, D),
    }


if __name__ == "__main__":
    B, S, D, n_head = 2, 8, 32, 4
    key = jax.random.PRNGKey(0)
    kx, kp = jax.random.split(key)
    x = jax.random.normal(kx, (B, S, D), jnp.float32)
    params = init_params(kp, D)

    prepped = prepare_params(params, n_head)   # one-time bf16 cast / Wo regroup
    out = clip_layer(x, prepped, n_head)
    out = jax.block_until_ready(out)

    ref = ref_forward(x, params, n_head)
    # bf16 MXU inputs + approx reciprocal => compare against the f32 reference
    # at bf16-appropriate tolerance.
    np.testing.assert_allclose(np.asarray(out), np.asarray(ref),
                               rtol=2e-2, atol=2e-2)
    print("KERNEL_OK")
</pallas_src>

<mosaic_0001>
module attributes {stable_mosaic.version = 11 : i64} {
  func.func @clip_layer_kernel(%arg0: i32, %arg1: memref<2x8x32xf32, #tpu.memory_space<vmem>>, %arg2: memref<8x8xf32, #tpu.memory_space<vmem>>, %arg3: memref<1x32xf32, #tpu.memory_space<vmem>>, %arg4: memref<1x32xf32, #tpu.memory_space<vmem>>, %arg5: memref<32x96xbf16, #tpu.memory_space<vmem>>, %arg6: memref<1x96xf32, #tpu.memory_space<vmem>>, %arg7: memref<2x16x32xbf16, #tpu.memory_space<vmem>>, %arg8: memref<1x32xf32, #tpu.memory_space<vmem>>, %arg9: memref<1x32xf32, #tpu.memory_space<vmem>>, %arg10: memref<1x32xf32, #tpu.memory_space<vmem>>, %arg11: memref<32x128xbf16, #tpu.memory_space<vmem>>, %arg12: memref<1x128xf32, #tpu.memory_space<vmem>>, %arg13: memref<128x32xbf16, #tpu.memory_space<vmem>>, %arg14: memref<1x32xf32, #tpu.memory_space<vmem>>, %arg15: memref<2x8x32xf32, #tpu.memory_space<vmem>>) attributes {dimension_semantics = [#tpu.dimension_semantics<parallel>], iteration_bounds = array<i64: 1>, scalar_prefetch = 0 : i64, scratch_operands = 0 : i64, tpu.core_type = #tpu.core_type<tc>, window_params = [{transform_indices = @transform_0, window_bounds = array<i64: 2, 8, 32>}, {pipeline_mode = #tpu.pipeline_mode<synchronous>, transform_indices = @transform_1, window_bounds = array<i64: 8, 8>}, {pipeline_mode = #tpu.pipeline_mode<synchronous>, transform_indices = @transform_2, window_bounds = array<i64: 1, 32>}, {pipeline_mode = #tpu.pipeline_mode<synchronous>, transform_indices = @transform_3, window_bounds = array<i64: 1, 32>}, {pipeline_mode = #tpu.pipeline_mode<synchronous>, transform_indices = @transform_4, window_bounds = array<i64: 32, 96>}, {pipeline_mode = #tpu.pipeline_mode<synchronous>, transform_indices = @transform_5, window_bounds = array<i64: 1, 96>}, {pipeline_mode = #tpu.pipeline_mode<synchronous>, transform_indices = @transform_6, window_bounds = array<i64: 2, 16, 32>}, {pipeline_mode = #tpu.pipeline_mode<synchronous>, transform_indices = @transform_7, window_bounds = array<i64: 1, 32>}, {pipeline_mode = #tpu.pipeline_mode<synchronous>, transform_indices = @transform_8, window_bounds = array<i64: 1, 32>}, {pipeline_mode = #tpu.pipeline_mode<synchronous>, transform_indices = @transform_9, window_bounds = array<i64: 1, 32>}, {pipeline_mode = #tpu.pipeline_mode<synchronous>, transform_indices = @transform_10, window_bounds = array<i64: 32, 128>}, {pipeline_mode = #tpu.pipeline_mode<synchronous>, transform_indices = @transform_11, window_bounds = array<i64: 1, 128>}, {pipeline_mode = #tpu.pipeline_mode<synchronous>, transform_indices = @transform_12, window_bounds = array<i64: 128, 32>}, {pipeline_mode = #tpu.pipeline_mode<synchronous>, transform_indices = @transform_13, window_bounds = array<i64: 1, 32>}, {transform_indices = @transform_14, window_bounds = array<i64: 2, 8, 32>}]} {
    %c0 = arith.constant 0 : index
    %c0_0 = arith.constant 0 : index
    %c0_1 = arith.constant 0 : index
    %0 = vector.load %arg1[%c0, %c0_0, %c0_1] : memref<2x8x32xf32, #tpu.memory_space<vmem>>, vector<2x8x32xf32>
    %1 = vector.shape_cast %0 : vector<2x8x32xf32> to vector<16x32xf32>
    %c0_2 = arith.constant 0 : index
    %c0_3 = arith.constant 0 : index
    %2 = vector.load %arg3[%c0_2, %c0_3] : memref<1x32xf32, #tpu.memory_space<vmem>>, vector<1x32xf32>
    %c0_4 = arith.constant 0 : index
    %c0_5 = arith.constant 0 : index
    %3 = vector.load %arg4[%c0_4, %c0_5] : memref<1x32xf32, #tpu.memory_space<vmem>>, vector<1x32xf32>
    %cst = arith.constant dense<0.000000e+00> : vector<16xf32>
    %4 = vector.multi_reduction <add>, %1, %cst [1] : vector<16x32xf32> to vector<16xf32>
    %5 = vector.shape_cast %4 : vector<16xf32> to vector<16x1xf32>
    %cst_6 = arith.constant 3.200000e+01 : f32
    %6 = vector.broadcast %cst_6 : f32 to vector<16x1xf32>
    %7 = arith.divf %5, %6 : vector<16x1xf32>
    %8 = vector.broadcast %7 : vector<16x1xf32> to vector<16x32xf32>
    %9 = arith.subf %1, %8 : vector<16x32xf32>
    %10 = arith.mulf %9, %9 : vector<16x32xf32>
    %cst_7 = arith.constant dense<0.000000e+00> : vector<16xf32>
    %11 = vector.multi_reduction <add>, %10, %cst_7 [1] : vector<16x32xf32> to vector<16xf32>
    %12 = vector.shape_cast %11 : vector<16xf32> to vector<16x1xf32>
    %cst_8 = arith.constant 3.200000e+01 : f32
    %13 = vector.broadcast %cst_8 : f32 to vector<16x1xf32>
    %14 = arith.divf %12, %13 : vector<16x1xf32>
    %15 = vector.broadcast %7 : vector<16x1xf32> to vector<16x32xf32>
    %16 = arith.subf %1, %15 : vector<16x32xf32>
    %cst_9 = arith.constant 9.99999974E-6 : f32
    %17 = vector.broadcast %cst_9 : f32 to vector<16x1xf32>
    %18 = arith.addf %14, %17 : vector<16x1xf32>
    %19 = math.rsqrt %18 : vector<16x1xf32>
    %20 = vector.broadcast %19 : vector<16x1xf32> to vector<16x32xf32>
    %21 = arith.mulf %16, %20 : vector<16x32xf32>
    %22 = vector.broadcast %2 : vector<1x32xf32> to vector<16x32xf32>
    %23 = arith.mulf %21, %22 : vector<16x32xf32>
    %24 = vector.broadcast %3 : vector<1x32xf32> to vector<16x32xf32>
    %25 = arith.addf %23, %24 : vector<16x32xf32>
    %c0_10 = arith.constant 0 : index
    %c0_11 = arith.constant 0 : index
    %26 = vector.load %arg5[%c0_10, %c0_11] : memref<32x96xbf16, #tpu.memory_space<vmem>>, vector<32x96xbf16>
    %27 = arith.truncf %25 : vector<16x32xf32> to vector<16x32xbf16>
    %cst_12 = arith.constant dense<0.000000e+00> : vector<16x96xf32>
    %28 = tpu.matmul %27, %26, %cst_12 {dimension_numbers = #tpu.dot_dimension_numbers<[1], [0], [0], [1], [0, 0, 1, 1], [], []>} : vector<16x32xbf16>, vector<32x96xbf16>, vector<16x96xf32> -> vector<16x96xf32>
    %c0_13 = arith.constant 0 : index
    %c0_14 = arith.constant 0 : index
    %29 = vector.load %arg6[%c0_13, %c0_14] : memref<1x96xf32, #tpu.memory_space<vmem>>, vector<1x96xf32>
    %30 = vector.broadcast %29 : vector<1x96xf32> to vector<16x96xf32>
    %31 = arith.addf %28, %30 : vector<16x96xf32>
    %32 = vector.shape_cast %31 : vector<16x96xf32> to vector<2x8x96xf32>
    %c0_15 = arith.constant 0 : index
    %c0_16 = arith.constant 0 : index
    %33 = vector.load %arg2[%c0_15, %c0_16] : memref<8x8xf32, #tpu.memory_space<vmem>>, vector<8x8xf32>
    %34 = vector.extract_strided_slice %32 {offsets = [0, 0, 0], sizes = [1, 8, 32], strides = [1, 1, 1]} : vector<2x8x96xf32> to vector<1x8x32xf32>
    %35 = vector.shape_cast %34 : vector<1x8x32xf32> to vector<8x32xf32>
    %cst_17 = arith.constant 0.353553385 : f32
    %36 = vector.broadcast %cst_17 : f32 to vector<8x32xf32>
    %37 = arith.mulf %35, %36 : vector<8x32xf32>
    %38 = vector.extract_strided_slice %32 {offsets = [0, 0, 32], sizes = [1, 8, 32], strides = [1, 1, 1]} : vector<2x8x96xf32> to vector<1x8x32xf32>
    %39 = vector.shape_cast %38 : vector<1x8x32xf32> to vector<8x32xf32>
    %40 = vector.extract_strided_slice %32 {offsets = [0, 0, 64], sizes = [1, 8, 32], strides = [1, 1, 1]} : vector<2x8x96xf32> to vector<1x8x32xf32>
    %41 = vector.shape_cast %40 : vector<1x8x32xf32> to vector<8x32xf32>
    %cst_18 = arith.constant 0.000000e+00 : f32
    %42 = vector.broadcast %cst_18 : f32 to vector<8x32xf32>
    %43 = vector.extract_strided_slice %37 {offsets = [0, 0], sizes = [8, 16], strides = [1, 1]} : vector<8x32xf32> to vector<8x16xf32>
    %44 = arith.truncf %43 : vector<8x16xf32> to vector<8x16xbf16>
    %45 = vector.extract_strided_slice %39 {offsets = [0, 0], sizes = [8, 16], strides = [1, 1]} : vector<8x32xf32> to vector<8x16xf32>
    %46 = arith.truncf %45 : vector<8x16xf32> to vector<8x16xbf16>
    %47 = vector.extract_strided_slice %41 {offsets = [0, 0], sizes = [8, 16], strides = [1, 1]} : vector<8x32xf32> to vector<8x16xf32>
    %48 = arith.truncf %47 : vector<8x16xf32> to vector<8x16xbf16>
    %49 = vector.extract_strided_slice %44 {offsets = [0, 0], sizes = [8, 8], strides = [1, 1]} : vector<8x16xbf16> to vector<8x8xbf16>
    %50 = vector.extract_strided_slice %46 {offsets = [0, 0], sizes = [8, 8], strides = [1, 1]} : vector<8x16xbf16> to vector<8x8xbf16>
    %51 = vector.extract_strided_slice %48 {offsets = [0, 0], sizes = [8, 8], strides = [1, 1]} : vector<8x16xbf16> to vector<8x8xbf16>
    %cst_19 = arith.constant dense<0.000000e+00> : vector<8x8xf32>
    %52 = tpu.matmul %49, %50, %cst_19 {dimension_numbers = #tpu.dot_dimension_numbers<[1], [1], [0], [0], [0, 0, 1, 0], [], []>} : vector<8x8xbf16>, vector<8x8xbf16>, vector<8x8xf32> -> vector<8x8xf32>
    %53 = arith.addf %52, %33 : vector<8x8xf32>
    %cst_20 = arith.constant dense<0xFF800000> : vector<8xf32>
    %54 = vector.multi_reduction <maximumf>, %53, %cst_20 [1] : vector<8x8xf32> to vector<8xf32>
    %55 = vector.shape_cast %54 : vector<8xf32> to vector<8x1xf32>
    %56 = vector.broadcast %55 : vector<8x1xf32> to vector<8x8xf32>
    %57 = arith.subf %53, %56 : vector<8x8xf32>
    %58 = math.exp %57 : vector<8x8xf32>
    %cst_21 = arith.constant dense<0.000000e+00> : vector<8xf32>
    %59 = vector.multi_reduction <add>, %58, %cst_21 [1] : vector<8x8xf32> to vector<8xf32>
    %60 = vector.shape_cast %59 : vector<8xf32> to vector<8x1xf32>
    %61 = tpu.reciprocal %60 {approx = true} : vector<8x1xf32> -> vector<8x1xf32>
    %62 = vector.broadcast %61 : vector<8x1xf32> to vector<8x8xf32>
    %63 = arith.mulf %58, %62 : vector<8x8xf32>
    %64 = arith.truncf %63 : vector<8x8xf32> to vector<8x8xbf16>
    %cst_22 = arith.constant dense<0.000000e+00> : vector<8x8xf32>
    %65 = tpu.matmul %64, %51, %cst_22 {dimension_numbers = #tpu.dot_dimension_numbers<[1], [0], [0], [1], [0, 0, 1, 1], [], []>} : vector<8x8xbf16>, vector<8x8xbf16>, vector<8x8xf32> -> vector<8x8xf32>
    %66 = vector.extract_strided_slice %44 {offsets = [0, 8], sizes = [8, 8], strides = [1, 1]} : vector<8x16xbf16> to vector<8x8xbf16>
    %67 = vector.extract_strided_slice %46 {offsets = [0, 8], sizes = [8, 8], strides = [1, 1]} : vector<8x16xbf16> to vector<8x8xbf16>
    %68 = vector.extract_strided_slice %48 {offsets = [0, 8], sizes = [8, 8], strides = [1, 1]} : vector<8x16xbf16> to vector<8x8xbf16>
    %cst_23 = arith.constant dense<0.000000e+00> : vector<8x8xf32>
    %69 = tpu.matmul %66, %67, %cst_23 {dimension_numbers = #tpu.dot_dimension_numbers<[1], [1], [0], [0], [0, 0, 1, 0], [], []>} : vector<8x8xbf16>, vector<8x8xbf16>, vector<8x8xf32> -> vector<8x8xf32>
    %70 = arith.addf %69, %33 : vector<8x8xf32>
    %cst_24 = arith.constant dense<0xFF800000> : vector<8xf32>
    %71 = vector.multi_reduction <maximumf>, %70, %cst_24 [1] : vector<8x8xf32> to vector<8xf32>
    %72 = vector.shape_cast %71 : vector<8xf32> to vector<8x1xf32>
    %73 = vector.broadcast %72 : vector<8x1xf32> to vector<8x8xf32>
    %74 = arith.subf %70, %73 : vector<8x8xf32>
    %75 = math.exp %74 : vector<8x8xf32>
    %cst_25 = arith.constant dense<0.000000e+00> : vector<8xf32>
    %76 = vector.multi_reduction <add>, %75, %cst_25 [1] : vector<8x8xf32> to vector<8xf32>
    %77 = vector.shape_cast %76 : vector<8xf32> to vector<8x1xf32>
    %78 = tpu.reciprocal %77 {approx = true} : vector<8x1xf32> -> vector<8x1xf32>
    %79 = vector.broadcast %78 : vector<8x1xf32> to vector<8x8xf32>
    %80 = arith.mulf %75, %79 : vector<8x8xf32>
    %81 = arith.truncf %80 : vector<8x8xf32> to vector<8x8xbf16>
    %cst_26 = arith.constant dense<0.000000e+00> : vector<8x8xf32>
    %82 = tpu.matmul %81, %68, %cst_26 {dimension_numbers = #tpu.dot_dimension_numbers<[1], [0], [0], [1], [0, 0, 1, 1], [], []>} : vector<8x8xbf16>, vector<8x8xbf16>, vector<8x8xf32> -> vector<8x8xf32>
    %83 = tpu.concatenate %65, %82 in 1 : vector<8x8xf32>, vector<8x8xf32> -> vector<8x16xf32>
    %84 = arith.truncf %83 : vector<8x16xf32> to vector<8x16xbf16>
    %c0_27 = arith.constant 0 : index
    %c0_28 = arith.constant 0 : index
    %c0_29 = arith.constant 0 : index
    %85 = vector.load %arg7[%c0_27, %c0_28, %c0_29] : memref<2x16x32xbf16, #tpu.memory_space<vmem>>, vector<1x16x32xbf16>
    %86 = vector.shape_cast %85 : vector<1x16x32xbf16> to vector<16x32xbf16>
    %cst_30 = arith.constant dense<0.000000e+00> : vector<8x32xf32>
    %87 = tpu.matmul %84, %86, %cst_30 {dimension_numbers = #tpu.dot_dimension_numbers<[1], [0], [0], [1], [0, 0, 1, 1], [], []>} : vector<8x16xbf16>, vector<16x32xbf16>, vector<8x32xf32> -> vector<8x32xf32>
    %88 = arith.addf %42, %87 : vector<8x32xf32>
    %89 = vector.extract_strided_slice %37 {offsets = [0, 16], sizes = [8, 16], strides = [1, 1]} : vector<8x32xf32> to vector<8x16xf32>
    %90 = arith.truncf %89 : vector<8x16xf32> to vector<8x16xbf16>
    %91 = vector.extract_strided_slice %39 {offsets = [0, 16], sizes = [8, 16], strides = [1, 1]} : vector<8x32xf32> to vector<8x16xf32>
    %92 = arith.truncf %91 : vector<8x16xf32> to vector<8x16xbf16>
    %93 = vector.extract_strided_slice %41 {offsets = [0, 16], sizes = [8, 16], strides = [1, 1]} : vector<8x32xf32> to vector<8x16xf32>
    %94 = arith.truncf %93 : vector<8x16xf32> to vector<8x16xbf16>
    %95 = vector.extract_strided_slice %90 {offsets = [0, 0], sizes = [8, 8], strides = [1, 1]} : vector<8x16xbf16> to vector<8x8xbf16>
    %96 = vector.extract_strided_slice %92 {offsets = [0, 0], sizes = [8, 8], strides = [1, 1]} : vector<8x16xbf16> to vector<8x8xbf16>
    %97 = vector.extract_strided_slice %94 {offsets = [0, 0], sizes = [8, 8], strides = [1, 1]} : vector<8x16xbf16> to vector<8x8xbf16>
    %cst_31 = arith.constant dense<0.000000e+00> : vector<8x8xf32>
    %98 = tpu.matmul %95, %96, %cst_31 {dimension_numbers = #tpu.dot_dimension_numbers<[1], [1], [0], [0], [0, 0, 1, 0], [], []>} : vector<8x8xbf16>, vector<8x8xbf16>, vector<8x8xf32> -> vector<8x8xf32>
    %99 = arith.addf %98, %33 : vector<8x8xf32>
    %cst_32 = arith.constant dense<0xFF800000> : vector<8xf32>
    %100 = vector.multi_reduction <maximumf>, %99, %cst_32 [1] : vector<8x8xf32> to vector<8xf32>
    %101 = vector.shape_cast %100 : vector<8xf32> to vector<8x1xf32>
    %102 = vector.broadcast %101 : vector<8x1xf32> to vector<8x8xf32>
    %103 = arith.subf %99, %102 : vector<8x8xf32>
    %104 = math.exp %103 : vector<8x8xf32>
    %cst_33 = arith.constant dense<0.000000e+00> : vector<8xf32>
    %105 = vector.multi_reduction <add>, %104, %cst_33 [1] : vector<8x8xf32> to vector<8xf32>
    %106 = vector.shape_cast %105 : vector<8xf32> to vector<8x1xf32>
    %107 = tpu.reciprocal %106 {approx = true} : vector<8x1xf32> -> vector<8x1xf32>
    %108 = vector.broadcast %107 : vector<8x1xf32> to vector<8x8xf32>
    %109 = arith.mulf %104, %108 : vector<8x8xf32>
    %110 = arith.truncf %109 : vector<8x8xf32> to vector<8x8xbf16>
    %cst_34 = arith.constant dense<0.000000e+00> : vector<8x8xf32>
    %111 = tpu.matmul %110, %97, %cst_34 {dimension_numbers = #tpu.dot_dimension_numbers<[1], [0], [0], [1], [0, 0, 1, 1], [], []>} : vector<8x8xbf16>, vector<8x8xbf16>, vector<8x8xf32> -> vector<8x8xf32>
    %112 = vector.extract_strided_slice %90 {offsets = [0, 8], sizes = [8, 8], strides = [1, 1]} : vector<8x16xbf16> to vector<8x8xbf16>
    %113 = vector.extract_strided_slice %92 {offsets = [0, 8], sizes = [8, 8], strides = [1, 1]} : vector<8x16xbf16> to vector<8x8xbf16>
    %114 = vector.extract_strided_slice %94 {offsets = [0, 8], sizes = [8, 8], strides = [1, 1]} : vector<8x16xbf16> to vector<8x8xbf16>
    %cst_35 = arith.constant dense<0.000000e+00> : vector<8x8xf32>
    %115 = tpu.matmul %112, %113, %cst_35 {dimension_numbers = #tpu.dot_dimension_numbers<[1], [1], [0], [0], [0, 0, 1, 0], [], []>} : vector<8x8xbf16>, vector<8x8xbf16>, vector<8x8xf32> -> vector<8x8xf32>
    %116 = arith.addf %115, %33 : vector<8x8xf32>
    %cst_36 = arith.constant dense<0xFF800000> : vector<8xf32>
    %117 = vector.multi_reduction <maximumf>, %116, %cst_36 [1] : vector<8x8xf32> to vector<8xf32>
    %118 = vector.shape_cast %117 : vector<8xf32> to vector<8x1xf32>
    %119 = vector.broadcast %118 : vector<8x1xf32> to vector<8x8xf32>
    %120 = arith.subf %116, %119 : vector<8x8xf32>
    %121 = math.exp %120 : vector<8x8xf32>
    %cst_37 = arith.constant dense<0.000000e+00> : vector<8xf32>
    %122 = vector.multi_reduction <add>, %121, %cst_37 [1] : vector<8x8xf32> to vector<8xf32>
    %123 = vector.shape_cast %122 : vector<8xf32> to vector<8x1xf32>
    %124 = tpu.reciprocal %123 {approx = true} : vector<8x1xf32> -> vector<8x1xf32>
    %125 = vector.broadcast %124 : vector<8x1xf32> to vector<8x8xf32>
    %126 = arith.mulf %121, %125 : vector<8x8xf32>
    %127 = arith.truncf %126 : vector<8x8xf32> to vector<8x8xbf16>
    %cst_38 = arith.constant dense<0.000000e+00> : vector<8x8xf32>
    %128 = tpu.matmul %127, %114, %cst_38 {dimension_numbers = #tpu.dot_dimension_numbers<[1], [0], [0], [1], [0, 0, 1, 1], [], []>} : vector<8x8xbf16>, vector<8x8xbf16>, vector<8x8xf32> -> vector<8x8xf32>
    %129 = tpu.concatenate %111, %128 in 1 : vector<8x8xf32>, vector<8x8xf32> -> vector<8x16xf32>
    %130 = arith.truncf %129 : vector<8x16xf32> to vector<8x16xbf16>
    %c1 = arith.constant 1 : index
    %c0_39 = arith.constant 0 : index
    %c0_40 = arith.constant 0 : index
    %131 = vector.load %arg7[%c1, %c0_39, %c0_40] : memref<2x16x32xbf16, #tpu.memory_space<vmem>>, vector<1x16x32xbf16>
    %132 = vector.shape_cast %131 : vector<1x16x32xbf16> to vector<16x32xbf16>
    %cst_41 = arith.constant dense<0.000000e+00> : vector<8x32xf32>
    %133 = tpu.matmul %130, %132, %cst_41 {dimension_numbers = #tpu.dot_dimension_numbers<[1], [0], [0], [1], [0, 0, 1, 1], [], []>} : vector<8x16xbf16>, vector<16x32xbf16>, vector<8x32xf32> -> vector<8x32xf32>
    %134 = arith.addf %88, %133 : vector<8x32xf32>
    %135 = vector.extract_strided_slice %32 {offsets = [1, 0, 0], sizes = [1, 8, 32], strides = [1, 1, 1]} : vector<2x8x96xf32> to vector<1x8x32xf32>
    %136 = vector.shape_cast %135 : vector<1x8x32xf32> to vector<8x32xf32>
    %cst_42 = arith.constant 0.353553385 : f32
    %137 = vector.broadcast %cst_42 : f32 to vector<8x32xf32>
    %138 = arith.mulf %136, %137 : vector<8x32xf32>
    %139 = vector.extract_strided_slice %32 {offsets = [1, 0, 32], sizes = [1, 8, 32], strides = [1, 1, 1]} : vector<2x8x96xf32> to vector<1x8x32xf32>
    %140 = vector.shape_cast %139 : vector<1x8x32xf32> to vector<8x32xf32>
    %141 = vector.extract_strided_slice %32 {offsets = [1, 0, 64], sizes = [1, 8, 32], strides = [1, 1, 1]} : vector<2x8x96xf32> to vector<1x8x32xf32>
    %142 = vector.shape_cast %141 : vector<1x8x32xf32> to vector<8x32xf32>
    %cst_43 = arith.constant 0.000000e+00 : f32
    %143 = vector.broadcast %cst_43 : f32 to vector<8x32xf32>
    %144 = vector.extract_strided_slice %138 {offsets = [0, 0], sizes = [8, 16], strides = [1, 1]} : vector<8x32xf32> to vector<8x16xf32>
    %145 = arith.truncf %144 : vector<8x16xf32> to vector<8x16xbf16>
    %146 = vector.extract_strided_slice %140 {offsets = [0, 0], sizes = [8, 16], strides = [1, 1]} : vector<8x32xf32> to vector<8x16xf32>
    %147 = arith.truncf %146 : vector<8x16xf32> to vector<8x16xbf16>
    %148 = vector.extract_strided_slice %142 {offsets = [0, 0], sizes = [8, 16], strides = [1, 1]} : vector<8x32xf32> to vector<8x16xf32>
    %149 = arith.truncf %148 : vector<8x16xf32> to vector<8x16xbf16>
    %150 = vector.extract_strided_slice %145 {offsets = [0, 0], sizes = [8, 8], strides = [1, 1]} : vector<8x16xbf16> to vector<8x8xbf16>
    %151 = vector.extract_strided_slice %147 {offsets = [0, 0], sizes = [8, 8], strides = [1, 1]} : vector<8x16xbf16> to vector<8x8xbf16>
    %152 = vector.extract_strided_slice %149 {offsets = [0, 0], sizes = [8, 8], strides = [1, 1]} : vector<8x16xbf16> to vector<8x8xbf16>
    %cst_44 = arith.constant dense<0.000000e+00> : vector<8x8xf32>
    %153 = tpu.matmul %150, %151, %cst_44 {dimension_numbers = #tpu.dot_dimension_numbers<[1], [1], [0], [0], [0, 0, 1, 0], [], []>} : vector<8x8xbf16>, vector<8x8xbf16>, vector<8x8xf32> -> vector<8x8xf32>
    %154 = arith.addf %153, %33 : vector<8x8xf32>
    %cst_45 = arith.constant dense<0xFF800000> : vector<8xf32>
    %155 = vector.multi_reduction <maximumf>, %154, %cst_45 [1] : vector<8x8xf32> to vector<8xf32>
    %156 = vector.shape_cast %155 : vector<8xf32> to vector<8x1xf32>
    %157 = vector.broadcast %156 : vector<8x1xf32> to vector<8x8xf32>
    %158 = arith.subf %154, %157 : vector<8x8xf32>
    %159 = math.exp %158 : vector<8x8xf32>
    %cst_46 = arith.constant dense<0.000000e+00> : vector<8xf32>
    %160 = vector.multi_reduction <add>, %159, %cst_46 [1] : vector<8x8xf32> to vector<8xf32>
    %161 = vector.shape_cast %160 : vector<8xf32> to vector<8x1xf32>
    %162 = tpu.reciprocal %161 {approx = true} : vector<8x1xf32> -> vector<8x1xf32>
    %163 = vector.broadcast %162 : vector<8x1xf32> to vector<8x8xf32>
    %164 = arith.mulf %159, %163 : vector<8x8xf32>
    %165 = arith.truncf %164 : vector<8x8xf32> to vector<8x8xbf16>
    %cst_47 = arith.constant dense<0.000000e+00> : vector<8x8xf32>
    %166 = tpu.matmul %165, %152, %cst_47 {dimension_numbers = #tpu.dot_dimension_numbers<[1], [0], [0], [1], [0, 0, 1, 1], [], []>} : vector<8x8xbf16>, vector<8x8xbf16>, vector<8x8xf32> -> vector<8x8xf32>
    %167 = vector.extract_strided_slice %145 {offsets = [0, 8], sizes = [8, 8], strides = [1, 1]} : vector<8x16xbf16> to vector<8x8xbf16>
    %168 = vector.extract_strided_slice %147 {offsets = [0, 8], sizes = [8, 8], strides = [1, 1]} : vector<8x16xbf16> to vector<8x8xbf16>
    %169 = vector.extract_strided_slice %149 {offsets = [0, 8], sizes = [8, 8], strides = [1, 1]} : vector<8x16xbf16> to vector<8x8xbf16>
    %cst_48 = arith.constant dense<0.000000e+00> : vector<8x8xf32>
    %170 = tpu.matmul %167, %168, %cst_48 {dimension_numbers = #tpu.dot_dimension_numbers<[1], [1], [0], [0], [0, 0, 1, 0], [], []>} : vector<8x8xbf16>, vector<8x8xbf16>, vector<8x8xf32> -> vector<8x8xf32>
    %171 = arith.addf %170, %33 : vector<8x8xf32>
    %cst_49 = arith.constant dense<0xFF800000> : vector<8xf32>
    %172 = vector.multi_reduction <maximumf>, %171, %cst_49 [1] : vector<8x8xf32> to vector<8xf32>
    %173 = vector.shape_cast %172 : vector<8xf32> to vector<8x1xf32>
    %174 = vector.broadcast %173 : vector<8x1xf32> to vector<8x8xf32>
    %175 = arith.subf %171, %174 : vector<8x8xf32>
    %176 = math.exp %175 : vector<8x8xf32>
    %cst_50 = arith.constant dense<0.000000e+00> : vector<8xf32>
    %177 = vector.multi_reduction <add>, %176, %cst_50 [1] : vector<8x8xf32> to vector<8xf32>
    %178 = vector.shape_cast %177 : vector<8xf32> to vector<8x1xf32>
    %179 = tpu.reciprocal %178 {approx = true} : vector<8x1xf32> -> vector<8x1xf32>
    %180 = vector.broadcast %179 : vector<8x1xf32> to vector<8x8xf32>
    %181 = arith.mulf %176, %180 : vector<8x8xf32>
    %182 = arith.truncf %181 : vector<8x8xf32> to vector<8x8xbf16>
    %cst_51 = arith.constant dense<0.000000e+00> : vector<8x8xf32>
    %183 = tpu.matmul %182, %169, %cst_51 {dimension_numbers = #tpu.dot_dimension_numbers<[1], [0], [0], [1], [0, 0, 1, 1], [], []>} : vector<8x8xbf16>, vector<8x8xbf16>, vector<8x8xf32> -> vector<8x8xf32>
    %184 = tpu.concatenate %166, %183 in 1 : vector<8x8xf32>, vector<8x8xf32> -> vector<8x16xf32>
    %185 = arith.truncf %184 : vector<8x16xf32> to vector<8x16xbf16>
    %c0_52 = arith.constant 0 : index
    %c0_53 = arith.constant 0 : index
    %c0_54 = arith.constant 0 : index
    %186 = vector.load %arg7[%c0_52, %c0_53, %c0_54] : memref<2x16x32xbf16, #tpu.memory_space<vmem>>, vector<1x16x32xbf16>
    %187 = vector.shape_cast %186 : vector<1x16x32xbf16> to vector<16x32xbf16>
    %cst_55 = arith.constant dense<0.000000e+00> : vector<8x32xf32>
    %188 = tpu.matmul %185, %187, %cst_55 {dimension_numbers = #tpu.dot_dimension_numbers<[1], [0], [0], [1], [0, 0, 1, 1], [], []>} : vector<8x16xbf16>, vector<16x32xbf16>, vector<8x32xf32> -> vector<8x32xf32>
    %189 = arith.addf %143, %188 : vector<8x32xf32>
    %190 = vector.extract_strided_slice %138 {offsets = [0, 16], sizes = [8, 16], strides = [1, 1]} : vector<8x32xf32> to vector<8x16xf32>
    %191 = arith.truncf %190 : vector<8x16xf32> to vector<8x16xbf16>
    %192 = vector.extract_strided_slice %140 {offsets = [0, 16], sizes = [8, 16], strides = [1, 1]} : vector<8x32xf32> to vector<8x16xf32>
    %193 = arith.truncf %192 : vector<8x16xf32> to vector<8x16xbf16>
    %194 = vector.extract_strided_slice %142 {offsets = [0, 16], sizes = [8, 16], strides = [1, 1]} : vector<8x32xf32> to vector<8x16xf32>
    %195 = arith.truncf %194 : vector<8x16xf32> to vector<8x16xbf16>
    %196 = vector.extract_strided_slice %191 {offsets = [0, 0], sizes = [8, 8], strides = [1, 1]} : vector<8x16xbf16> to vector<8x8xbf16>
    %197 = vector.extract_strided_slice %193 {offsets = [0, 0], sizes = [8, 8], strides = [1, 1]} : vector<8x16xbf16> to vector<8x8xbf16>
    %198 = vector.extract_strided_slice %195 {offsets = [0, 0], sizes = [8, 8], strides = [1, 1]} : vector<8x16xbf16> to vector<8x8xbf16>
    %cst_56 = arith.constant dense<0.000000e+00> : vector<8x8xf32>
    %199 = tpu.matmul %196, %197, %cst_56 {dimension_numbers = #tpu.dot_dimension_numbers<[1], [1], [0], [0], [0, 0, 1, 0], [], []>} : vector<8x8xbf16>, vector<8x8xbf16>, vector<8x8xf32> -> vector<8x8xf32>
    %200 = arith.addf %199, %33 : vector<8x8xf32>
    %cst_57 = arith.constant dense<0xFF800000> : vector<8xf32>
    %201 = vector.multi_reduction <maximumf>, %200, %cst_57 [1] : vector<8x8xf32> to vector<8xf32>
    %202 = vector.shape_cast %201 : vector<8xf32> to vector<8x1xf32>
    %203 = vector.broadcast %202 : vector<8x1xf32> to vector<8x8xf32>
    %204 = arith.subf %200, %203 : vector<8x8xf32>
    %205 = math.exp %204 : vector<8x8xf32>
    %cst_58 = arith.constant dense<0.000000e+00> : vector<8xf32>
    %206 = vector.multi_reduction <add>, %205, %cst_58 [1] : vector<8x8xf32> to vector<8xf32>
    %207 = vector.shape_cast %206 : vector<8xf32> to vector<8x1xf32>
    %208 = tpu.reciprocal %207 {approx = true} : vector<8x1xf32> -> vector<8x1xf32>
    %209 = vector.broadcast %208 : vector<8x1xf32> to vector<8x8xf32>
    %210 = arith.mulf %205, %209 : vector<8x8xf32>
    %211 = arith.truncf %210 : vector<8x8xf32> to vector<8x8xbf16>
    %cst_59 = arith.constant dense<0.000000e+00> : vector<8x8xf32>
    %212 = tpu.matmul %211, %198, %cst_59 {dimension_numbers = #tpu.dot_dimension_numbers<[1], [0], [0], [1], [0, 0, 1, 1], [], []>} : vector<8x8xbf16>, vector<8x8xbf16>, vector<8x8xf32> -> vector<8x8xf32>
    %213 = vector.extract_strided_slice %191 {offsets = [0, 8], sizes = [8, 8], strides = [1, 1]} : vector<8x16xbf16> to vector<8x8xbf16>
    %214 = vector.extract_strided_slice %193 {offsets = [0, 8], sizes = [8, 8], strides = [1, 1]} : vector<8x16xbf16> to vector<8x8xbf16>
    %215 = vector.extract_strided_slice %195 {offsets = [0, 8], sizes = [8, 8], strides = [1, 1]} : vector<8x16xbf16> to vector<8x8xbf16>
    %cst_60 = arith.constant dense<0.000000e+00> : vector<8x8xf32>
    %216 = tpu.matmul %213, %214, %cst_60 {dimension_numbers = #tpu.dot_dimension_numbers<[1], [1], [0], [0], [0, 0, 1, 0], [], []>} : vector<8x8xbf16>, vector<8x8xbf16>, vector<8x8xf32> -> vector<8x8xf32>
    %217 = arith.addf %216, %33 : vector<8x8xf32>
    %cst_61 = arith.constant dense<0xFF800000> : vector<8xf32>
    %218 = vector.multi_reduction <maximumf>, %217, %cst_61 [1] : vector<8x8xf32> to vector<8xf32>
    %219 = vector.shape_cast %218 : vector<8xf32> to vector<8x1xf32>
    %220 = vector.broadcast %219 : vector<8x1xf32> to vector<8x8xf32>
    %221 = arith.subf %217, %220 : vector<8x8xf32>
    %222 = math.exp %221 : vector<8x8xf32>
    %cst_62 = arith.constant dense<0.000000e+00> : vector<8xf32>
    %223 = vector.multi_reduction <add>, %222, %cst_62 [1] : vector<8x8xf32> to vector<8xf32>
    %224 = vector.shape_cast %223 : vector<8xf32> to vector<8x1xf32>
    %225 = tpu.reciprocal %224 {approx = true} : vector<8x1xf32> -> vector<8x1xf32>
    %226 = vector.broadcast %225 : vector<8x1xf32> to vector<8x8xf32>
    %227 = arith.mulf %222, %226 : vector<8x8xf32>
    %228 = arith.truncf %227 : vector<8x8xf32> to vector<8x8xbf16>
    %cst_63 = arith.constant dense<0.000000e+00> : vector<8x8xf32>
    %229 = tpu.matmul %228, %215, %cst_63 {dimension_numbers = #tpu.dot_dimension_numbers<[1], [0], [0], [1], [0, 0, 1, 1], [], []>} : vector<8x8xbf16>, vector<8x8xbf16>, vector<8x8xf32> -> vector<8x8xf32>
    %230 = tpu.concatenate %212, %229 in 1 : vector<8x8xf32>, vector<8x8xf32> -> vector<8x16xf32>
    %231 = arith.truncf %230 : vector<8x16xf32> to vector<8x16xbf16>
    %c1_64 = arith.constant 1 : index
    %c0_65 = arith.constant 0 : index
    %c0_66 = arith.constant 0 : index
    %232 = vector.load %arg7[%c1_64, %c0_65, %c0_66] : memref<2x16x32xbf16, #tpu.memory_space<vmem>>, vector<1x16x32xbf16>
    %233 = vector.shape_cast %232 : vector<1x16x32xbf16> to vector<16x32xbf16>
    %cst_67 = arith.constant dense<0.000000e+00> : vector<8x32xf32>
    %234 = tpu.matmul %231, %233, %cst_67 {dimension_numbers = #tpu.dot_dimension_numbers<[1], [0], [0], [1], [0, 0, 1, 1], [], []>} : vector<8x16xbf16>, vector<16x32xbf16>, vector<8x32xf32> -> vector<8x32xf32>
    %235 = arith.addf %189, %234 : vector<8x32xf32>
    %236 = tpu.concatenate %134, %235 in 0 : vector<8x32xf32>, vector<8x32xf32> -> vector<16x32xf32>
    %c0_68 = arith.constant 0 : index
    %c0_69 = arith.constant 0 : index
    %237 = vector.load %arg8[%c0_68, %c0_69] : memref<1x32xf32, #tpu.memory_space<vmem>>, vector<1x32xf32>
    %238 = vector.broadcast %237 : vector<1x32xf32> to vector<16x32xf32>
    %239 = arith.addf %236, %238 : vector<16x32xf32>
    %240 = arith.addf %239, %1 : vector<16x32xf32>
    %c0_70 = arith.constant 0 : index
    %c0_71 = arith.constant 0 : index
    %241 = vector.load %arg9[%c0_70, %c0_71] : memref<1x32xf32, #tpu.memory_space<vmem>>, vector<1x32xf32>
    %c0_72 = arith.constant 0 : index
    %c0_73 = arith.constant 0 : index
    %242 = vector.load %arg10[%c0_72, %c0_73] : memref<1x32xf32, #tpu.memory_space<vmem>>, vector<1x32xf32>
    %cst_74 = arith.constant dense<0.000000e+00> : vector<16xf32>
    %243 = vector.multi_reduction <add>, %240, %cst_74 [1] : vector<16x32xf32> to vector<16xf32>
    %244 = vector.shape_cast %243 : vector<16xf32> to vector<16x1xf32>
    %cst_75 = arith.constant 3.200000e+01 : f32
    %245 = vector.broadcast %cst_75 : f32 to vector<16x1xf32>
    %246 = arith.divf %244, %245 : vector<16x1xf32>
    %247 = vector.broadcast %246 : vector<16x1xf32> to vector<16x32xf32>
    %248 = arith.subf %240, %247 : vector<16x32xf32>
    %249 = arith.mulf %248, %248 : vector<16x32xf32>
    %cst_76 = arith.constant dense<0.000000e+00> : vector<16xf32>
    %250 = vector.multi_reduction <add>, %249, %cst_76 [1] : vector<16x32xf32> to vector<16xf32>
    %251 = vector.shape_cast %250 : vector<16xf32> to vector<16x1xf32>
    %cst_77 = arith.constant 3.200000e+01 : f32
    %252 = vector.broadcast %cst_77 : f32 to vector<16x1xf32>
    %253 = arith.divf %251, %252 : vector<16x1xf32>
    %254 = vector.broadcast %246 : vector<16x1xf32> to vector<16x32xf32>
    %255 = arith.subf %240, %254 : vector<16x32xf32>
    %cst_78 = arith.constant 9.99999974E-6 : f32
    %256 = vector.broadcast %cst_78 : f32 to vector<16x1xf32>
    %257 = arith.addf %253, %256 : vector<16x1xf32>
    %258 = math.rsqrt %257 : vector<16x1xf32>
    %259 = vector.broadcast %258 : vector<16x1xf32> to vector<16x32xf32>
    %260 = arith.mulf %255, %259 : vector<16x32xf32>
    %261 = vector.broadcast %241 : vector<1x32xf32> to vector<16x32xf32>
    %262 = arith.mulf %260, %261 : vector<16x32xf32>
    %263 = vector.broadcast %242 : vector<1x32xf32> to vector<16x32xf32>
    %264 = arith.addf %262, %263 : vector<16x32xf32>
    %c0_79 = arith.constant 0 : index
    %c0_80 = arith.constant 0 : index
    %265 = vector.load %arg11[%c0_79, %c0_80] : memref<32x128xbf16, #tpu.memory_space<vmem>>, vector<32x128xbf16>
    %266 = arith.truncf %264 : vector<16x32xf32> to vector<16x32xbf16>
    %cst_81 = arith.constant dense<0.000000e+00> : vector<16x128xf32>
    %267 = tpu.matmul %266, %265, %cst_81 {dimension_numbers = #tpu.dot_dimension_numbers<[1], [0], [0], [1], [0, 0, 1, 1], [], []>} : vector<16x32xbf16>, vector<32x128xbf16>, vector<16x128xf32> -> vector<16x128xf32>
    %c0_82 = arith.constant 0 : index
    %c0_83 = arith.constant 0 : index
    %268 = vector.load %arg12[%c0_82, %c0_83] : memref<1x128xf32, #tpu.memory_space<vmem>>, vector<1x128xf32>
    %269 = vector.broadcast %268 : vector<1x128xf32> to vector<16x128xf32>
    %270 = arith.addf %267, %269 : vector<16x128xf32>
    %cst_84 = arith.constant 1.702000e+00 : f32
    %271 = vector.broadcast %cst_84 : f32 to vector<16x128xf32>
    %272 = arith.mulf %271, %270 : vector<16x128xf32>
    %273 = arith.negf %272 : vector<16x128xf32>
    %274 = math.exp %273 : vector<16x128xf32>
    %cst_85 = arith.constant 1.000000e+00 : f32
    %275 = vector.broadcast %cst_85 : f32 to vector<16x128xf32>
    %276 = arith.addf %275, %274 : vector<16x128xf32>
    %277 = arith.divf %275, %276 : vector<16x128xf32>
    %278 = arith.mulf %270, %277 : vector<16x128xf32>
    %c0_86 = arith.constant 0 : index
    %c0_87 = arith.constant 0 : index
    %279 = vector.load %arg13[%c0_86, %c0_87] : memref<128x32xbf16, #tpu.memory_space<vmem>>, vector<128x32xbf16>
    %280 = arith.truncf %278 : vector<16x128xf32> to vector<16x128xbf16>
    %cst_88 = arith.constant dense<0.000000e+00> : vector<16x32xf32>
    %281 = tpu.matmul %280, %279, %cst_88 {dimension_numbers = #tpu.dot_dimension_numbers<[1], [0], [0], [1], [0, 0, 1, 1], [], []>} : vector<16x128xbf16>, vector<128x32xbf16>, vector<16x32xf32> -> vector<16x32xf32>
    %c0_89 = arith.constant 0 : index
    %c0_90 = arith.constant 0 : index
    %282 = vector.load %arg14[%c0_89, %c0_90] : memref<1x32xf32, #tpu.memory_space<vmem>>, vector<1x32xf32>
    %283 = vector.broadcast %282 : vector<1x32xf32> to vector<16x32xf32>
    %284 = arith.addf %281, %283 : vector<16x32xf32>
    %285 = arith.addf %284, %240 : vector<16x32xf32>
    %286 = vector.shape_cast %285 : vector<16x32xf32> to vector<2x8x32xf32>
    %c0_91 = arith.constant 0 : index
    %c0_92 = arith.constant 0 : index
    %c0_93 = arith.constant 0 : index
    %287 = vector.load %arg15[%c0_91, %c0_92, %c0_93] : memref<2x8x32xf32, #tpu.memory_space<vmem>>, vector<2x8x32xf32>
    tpu.vector_store %arg15[%c0_91, %c0_92, %c0_93], %286 {strides = array<i32>} : memref<2x8x32xf32, #tpu.memory_space<vmem>>, vector<2x8x32xf32>,
    return
  }
  func.func @transform_0(%arg0: i32) -> (i32, i32, i32) {
    %c0_i32 = arith.constant 0 : i32
    %c0_i32_0 = arith.constant 0 : i32
    %c0_i32_1 = arith.constant 0 : i32
    return %arg0, %c0_i32, %c0_i32_0 : i32, i32, i32
  }
  func.func @transform_1(%arg0: i32) -> (i32, i32) {
    %c0_i32 = arith.constant 0 : i32
    %c0_i32_0 = arith.constant 0 : i32
    %c0_i32_1 = arith.constant 0 : i32
    return %c0_i32, %c0_i32_0 : i32, i32
  }
  func.func @transform_2(%arg0: i32) -> (i32, i32) {
    %c0_i32 = arith.constant 0 : i32
    %c0_i32_0 = arith.constant 0 : i32
    %c0_i32_1 = arith.constant 0 : i32
    return %c0_i32, %c0_i32_0 : i32, i32
  }
  func.func @transform_3(%arg0: i32) -> (i32, i32) {
    %c0_i32 = arith.constant 0 : i32
    %c0_i32_0 = arith.constant 0 : i32
    %c0_i32_1 = arith.constant 0 : i32
    return %c0_i32, %c0_i32_0 : i32, i32
  }
  func.func @transform_4(%arg0: i32) -> (i32, i32) {
    %c0_i32 = arith.constant 0 : i32
    %c0_i32_0 = arith.constant 0 : i32
    %c0_i32_1 = arith.constant 0 : i32
    return %c0_i32, %c0_i32_0 : i32, i32
  }
  func.func @transform_5(%arg0: i32) -> (i32, i32) {
    %c0_i32 = arith.constant 0 : i32
    %c0_i32_0 = arith.constant 0 : i32
    %c0_i32_1 = arith.constant 0 : i32
    return %c0_i32, %c0_i32_0 : i32, i32
  }
  func.func @transform_6(%arg0: i32) -> (i32, i32, i32) {
    %c0_i32 = arith.constant 0 : i32
    %c0_i32_0 = arith.constant 0 : i32
    %c0_i32_1 = arith.constant 0 : i32
    %c0_i32_2 = arith.constant 0 : i32
    return %c0_i32, %c0_i32_0, %c0_i32_1 : i32, i32, i32
  }
  func.func @transform_7(%arg0: i32) -> (i32, i32) {
    %c0_i32 = arith.constant 0 : i32
    %c0_i32_0 = arith.constant 0 : i32
    %c0_i32_1 = arith.constant 0 : i32
    return %c0_i32, %c0_i32_0 : i32, i32
  }
  func.func @transform_8(%arg0: i32) -> (i32, i32) {
    %c0_i32 = arith.constant 0 : i32
    %c0_i32_0 = arith.constant 0 : i32
    %c0_i32_1 = arith.constant 0 : i32
    return %c0_i32, %c0_i32_0 : i32, i32
  }
  func.func @transform_9(%arg0: i32) -> (i32, i32) {
    %c0_i32 = arith.constant 0 : i32
    %c0_i32_0 = arith.constant 0 : i32
    %c0_i32_1 = arith.constant 0 : i32
    return %c0_i32, %c0_i32_0 : i32, i32
  }
  func.func @transform_10(%arg0: i32) -> (i32, i32) {
    %c0_i32 = arith.constant 0 : i32
    %c0_i32_0 = arith.constant 0 : i32
    %c0_i32_1 = arith.constant 0 : i32
    return %c0_i32, %c0_i32_0 : i32, i32
  }
  func.func @transform_11(%arg0: i32) -> (i32, i32) {
    %c0_i32 = arith.constant 0 : i32
    %c0_i32_0 = arith.constant 0 : i32
    %c0_i32_1 = arith.constant 0 : i32
    return %c0_i32, %c0_i32_0 : i32, i32
  }
  func.func @transform_12(%arg0: i32) -> (i32, i32) {
    %c0_i32 = arith.constant 0 : i32
    %c0_i32_0 = arith.constant 0 : i32
    %c0_i32_1 = arith.constant 0 : i32
    return %c0_i32, %c0_i32_0 : i32, i32
  }
  func.func @transform_13(%arg0: i32) -> (i32, i32) {
    %c0_i32 = arith.constant 0 : i32
    %c0_i32_0 = arith.constant 0 : i32
    %c0_i32_1 = arith.constant 0 : i32
    return %c0_i32, %c0_i32_0 : i32, i32
  }
  func.func @transform_14(%arg0: i32) -> (i32, i32, i32) {
    %c0_i32 = arith.constant 0 : i32
    %c0_i32_0 = arith.constant 0 : i32
    %c0_i32_1 = arith.constant 0 : i32
    return %arg0, %c0_i32, %c0_i32_0 : i32, i32, i32
  }
}

</mosaic_0001>

<bundles_post_ra>
// kernel: tpu_custom_call.1
= control target key start
LH: loop header
LB: loop body
LE: loop exit
PB: predicated region body
PF: predicated region fallthrough
CT: control target
= control target key end

     0   :  { %vm53_vm0 = vcmask 261120   ;;  %s2330_s0 = inlined_call_operand.vmem [shape: f32[2,8,32], index: 0, kind: input, shape index: {}]   ;;  %s2331_s1 = inlined_call_operand.vmem [shape: f32[8,8], index: 1, kind: input, shape index: {}]   ;;  %s2332_s2 = inlined_call_operand.vmem [shape: f32[1,32], index: 2, kind: input, shape index: {}]   ;;  %s2333_s3 = inlined_call_operand.vmem [shape: f32[1,32], index: 3, kind: input, shape index: {}]   ;;  %s2334_s4 = inlined_call_operand.vmem [shape: bf16[32,96], index: 4, kind: input, shape index: {}]   ;;  %s2335_s5 = inlined_call_operand.vmem [shape: f32[1,96], index: 5, kind: input, shape index: {}]   ;;  %s2336_s6 = inlined_call_operand.vmem [shape: bf16[2,16,32], index: 6, kind: input, shape index: {}]   ;;  %s2337_s7 = inlined_call_operand.vmem [shape: f32[1,32], index: 7, kind: input, shape index: {}]   ;;  %s2338_s8 = inlined_call_operand.vmem [shape: f32[1,32], index: 8, kind: input, shape index: {}]   ;;  %s2339_s9 = inlined_call_operand.vmem [shape: f32[1,32], index: 9, kind: input, shape index: {}]   ;;  %s2340_s10 = inlined_call_operand.vmem [shape: bf16[32,128], index: 10, kind: input, shape index: {}]   ;;  %s2341_s11 = inlined_call_operand.vmem [shape: f32[1,128], index: 11, kind: input, shape index: {}]   ;;  %s2342_s12 = inlined_call_operand.vmem [shape: bf16[128,32], index: 12, kind: input, shape index: {}]   ;;  %s2343_s13 = inlined_call_operand.vmem [shape: f32[1,32], index: 13, kind: input, shape index: {}]   ;;  %s2344_s14 = inlined_call_operand.hbm [shape: f32[2,8,32], index: 14, kind: output, shape index: {}]  }
   0x1   :  { %v2000_v0 = vld [vmem:[%s2330_s0] sm:$0xff]  ;;  %v2005_v1 = vld [vmem:[%s2330_s0 + $0x8] sm:$0xff] }
   0x2   :  { %v54_v2 = vsel %vm53_vm0, %v2000_v0, 0.0  ;;  %v57_v3 = vsel %vm53_vm0, %v2005_v1, 0.0 }
   0x3   :  { %55 = vadd.xlane.f32.xlu0 %v54_v2 }
   0x7   :  { %58 = vadd.xlane.f32.xlu0 %v57_v3 }
   0x8   :  { %19 = vsyncpa [#allocation3], 0  ;;  %v1820_v14 = vld [vmem:[%s2334_s4] sm:$0xff]   ;;  %v1906_v15 = vmov 0.0   ;;  %v1821_v16 = vld [vmem:[%s2334_s4 + $0x8] sm:$0xff]   ;;  %vm1907_vm1 = vmmov 0  }
   0x9   :  { %1643 = vmatprep.subr.bf16.mxu1 %v1906_v15  ;;  %1669 = vmatprep.subr.bf16.mxu0 %v1906_v15  ;;  %v1540_v25 = vld [vmem:[%s2332_s2] ss:$0 sm:$0xff]  ;;  %s1908_s2 = smov 96   ;;  %s1910_s25 = smov 80   ;;  %vm172_vm2 = vcmask 64512   ;;  %vm236_vm3 = vcmask 1043456  }
   0xa   :  { %1644 = vmatpush3.bf16.msra.mxu1 %v1820_v14  ;;  %1647 = vmatprep.mubr.msk.bf16.mxu1 %vm1907_vm1, %v1906_v15  ;;  %v1541_v29 = vld [vmem:[%s2333_s3] ss:$0 sm:$0xff]  ;;  %s1909_s3 = smov 88   ;;  %s1912_s28 = smov 64   ;;  %vm634_vm4 = vcmask 130048  }
   0xb   :  { %1645 = vmatprep.subr.bf16.mxu1 %v1906_v15  ;;  %1671 = vmatprep.mubr.msk.bf16.mxu0 %vm1907_vm1, %v1906_v15  ;;  %v1542_v34 = vld [vmem:[%s2335_s5] ss:$0 sm:$0xff]  ;;  %s1911_s5 = smov 72   ;;  %s1914_s29 = smov 112  }
   0xc   :  { %v2061_v46 = vld [vmem:[%s2331_s1] sm:$0xff]  ;;  %s1913_s1 = smov 120   ;;  %s1915_s30 = smov 104  }
   0xd   :  { %s1916_s15 = smov 48   ;;  %s1917_s16 = smov 56  }
   0xe   :  { %1646 = vmatpush3.bf16.msra.mxu1 %v1821_v16  ;;  %s1918_s0 = smov 40   ;;  %s1919_s19 = smov 8  }
   0xf   :  { %1651 = vmatprep.subr.bf16.mxu1 %v1906_v15 }
  0x90   :  { %v56_v4 = vpop.xlane.xlu0 %55 }
  0x91   :  { %v61_v5 = vmul.f32 0.03125, %v56_v4 }
  0x93   :  { %v63_v6 = vsub.f32 %v2000_v0, %v61_v5 }
  0x94   :  { %v59_v7 = vpop.xlane.xlu0 %58 }
  0x95   :  { %v62_v8 = vmul.f32 0.03125, %v59_v7  ;;  %v65_v9 = vmul.f32 %v63_v6, %v63_v6 }
  0x97   :  { %v64_v10 = vsub.f32 %v2005_v1, %v62_v8  ;;  %v67_v11 = vsel %vm53_vm0, %v65_v9, 0.0 }
  0x98   :  { %68 = vadd.xlane.f32.xlu1 %v67_v11 }
  0x99   :  { %v66_v12 = vmul.f32 %v64_v10, %v64_v10 }
  0x9b   :  { %v70_v13 = vsel %vm53_vm0, %v66_v12, 0.0 }
  0x9c   :  { %71 = vadd.xlane.f32.xlu1 %v70_v13 }
 0x125   :  { %v69_v17 = vpop.xlane.xlu1 %68 }
 0x126   :  { %v73_v18 = vmul.f32 0.03125, %v69_v17 }
 0x128   :  { %v75_v19 = vadd.f32 1e-05, %v73_v18 }
 0x129   :  { %v72_v20 = vpop.xlane.xlu1 %71 }
 0x12a   :  { %1834 = vrsqrt.f32 %v75_v19  ;;  %v74_v21 = vmul.f32 0.03125, %v72_v20 }
 0x12c   :  { %v76_v22 = vadd.f32 1e-05, %v74_v21 }
 0x12e   :  { %1836 = vrsqrt.f32 %v76_v22 }
 0x134   :  { %v1835_v23 = vpop.eup %1834 }
 0x135   :  { %v79_v24 = vmul.f32 %v1835_v23, %v63_v6 }
 0x137   :  { %v87_v28 = vmul.f32 %v1540_v25, %v79_v24 }
 0x138   :  { %v1837_v26 = vpop.eup %1836 }
 0x139   :  { %v80_v27 = vmul.f32 %v1837_v26, %v64_v10  ;;  %v95_v31 = vadd.f32 %v1541_v29, %v87_v28 }
 0x13b   :  { %v88_v30 = vmul.f32 %v1540_v25, %v80_v27 }
 0x13d   :  { %v96_v32 = vadd.f32 %v1541_v29, %v88_v30 }
 0x13f   :  { %v101_v33 = vpack.c.bf16 %v96_v32, %v95_v31 }
 0x141   :  { %1648 = vmatmul.mubr.msk.bf16.vlgmr.msra.gmra.mrb[0].mxu1 %vm53_vm0, %v101_v33 }
 0x142   :  { %1653 = vmatprep.mubr.msk.bf16.mxu1 %vm1907_vm1, %v1906_v15 }
 0x214   :  { %v158_v35 = vpop.f32.mrb[0].mxu1 }
 0x215   :  { %v159_v36 = vadd.f32 %v1542_v34, %v158_v35  ;;  %v1649_v37 = vpop.f32.mrb[1].mxu1 }
 0x216   :  { %v161_v38 = vpop.f32.mrb[2].mxu1 }
 0x217   :  { %v2041_v39 = vpack.c.bf16 %v159_v36, %v159_v36  ;;  %v2043_v40 = vadd.f32 %v1542_v34, %v161_v38  ;;  %v1650_v41 = vpop.f32.mrb[3].mxu1  ;;  %v166_v44 = vmul.f32 0.35355338, %v159_v36 }
 0x219   :  { %170 = vrot.lane.b32.xlu0 %v2041_v39, %s1908_s2  ;;  %v167_v45 = vpack.c.bf16 %v166_v44, %v166_v44 }
 0x21d   :  { %283 = vrot.lane.b32.xlu0 %v2041_v39, %s1909_s3 }
 0x221   :  { %401 = vrot.lane.b32.xlu0 %v2041_v39, %s1910_s25 }
 0x225   :  { %511 = vrot.lane.b32.xlu0 %v2041_v39, %s1911_s5 }
 0x28b   :  { %v171_v42 = vpop.permute.xlu0 %170 }
 0x28c   :  { %v177_v43 = vsel %vm172_vm2, %v171_v42, 0 }
 0x28d   :  { %1652 = vmatpush3.bf16.xpose.msra.mxu1 %v177_v43 }
 0x28e   :  { %1657 = vmatprep.subr.bf16.mxu1 %v1906_v15 }
 0x28f   :  { %v284_v63 = vpop.permute.xlu0 %283 }
 0x290   :  { %v289_v3 = vsel %vm172_vm2, %v284_v63, 0 }
 0x293   :  { %v402_v4 = vpop.permute.xlu0 %401 }
 0x294   :  { %1654 = vmatmul.mubr.msk.bf16.vlgmr.msra.gmra.mrb[4].mxu1 %vm172_vm2, %v167_v45  ;;  %v407_v6 = vsel %vm172_vm2, %v402_v4, 0 }
 0x295   :  { %1659 = vmatprep.mubr.msk.bf16.mxu1 %vm1907_vm1, %v1906_v15 }
 0x297   :  { %v512_v7 = vpop.permute.xlu0 %511 }
 0x298   :  { %v517_v9 = vsel %vm172_vm2, %v512_v7, 0 }
 0x367   :  { %v213_v47 = vpop.f32.mrb[4].mxu1 }
 0x368   :  { %v214_v48 = vadd.f32 %v213_v47, %v2061_v46  ;;  %v1655_v49 = vpop.f32.mrb[5].mxu1 }
 0x369   :  { %v216_v50 = vpop.f32.mrb[6].mxu1 }
 0x36a   :  { %v1656_v51 = vpop.f32.mrb[7].mxu1  ;;  %v219_v52 = vsel %vm172_vm2, %v214_v48, -inf }
 0x36b   :  { %220 = vmax.xlane.f32.xlu1 %v219_v52  ;;  %v727_v52 = vmul.f32 0.35355338, %v2043_v40 }
 0x3f8   :  { %v221_v53 = vpop.xlane.xlu1 %220 }
 0x3f9   :  { %v222_v54 = vsub.f32 %v214_v48, %v221_v53  ;;  %v2109_v53 = vpack.c.bf16 %v2043_v40, %v2043_v40 }
 0x3fb   :  { %v223_v55 = vmul.f32 1.442695, %v222_v54  ;;  %v2115_v54 = vpack.c.bf16 %v727_v52, %v727_v52 }
 0x3fd   :  { %1838 = vpow2.f32 %v223_v55 }
 0x407   :  { %v1839_v56 = vpop.eup %1838 }
 0x408   :  { %v225_v57 = vsel %vm172_vm2, %v1839_v56, 0.0 }
 0x409   :  { %226 = vadd.xlane.f32.xlu1 %v225_v57 }
 0x41a   :  { %231 = vrot.lane.b32.xlu1 %v2041_v39, %s1912_s28 }
 0x41e   :  { %281 = vrot.lane.b32.xlu1 %v167_v45, %s1913_s1 }
 0x422   :  { %399 = vrot.lane.b32.xlu1 %v167_v45, %s1914_s29 }
 0x426   :  { %509 = vrot.lane.b32.xlu1 %v167_v45, %s1915_s30 }
 0x496   :  { %v227_v58 = vpop.xlane.xlu1 %226 }
 0x497   :  { %1840 = vrcp.f32 %v227_v58 }
 0x49a   :  { %v232_v59 = vpop.permute.xlu1 %231 }
 0x49b   :  { %v238_v60 = vsel %vm236_vm3, %v232_v59, 0 }
 0x49c   :  { %1658 = vmatpush3.bf16.msra.mxu1 %v238_v60 }
 0x49d   :  { %1663 = vmatprep.subr.bf16.mxu1 %v1906_v15 }
 0x49e   :  { %v282_v5 = vpop.permute.xlu1 %281 }
 0x4a1   :  { %v1841_v61 = vpop.eup %1840 }
 0x4a2   :  { %v229_v62 = vmul.f32 %v1841_v61, %v1839_v56  ;;  %v400_v8 = vpop.permute.xlu1 %399 }
 0x4a4   :  { %v230_v2 = vpack.c.bf16 %v229_v62, %v229_v62 }
 0x4a6   :  { %1660 = vmatmul.mubr.msk.bf16.vlgmr.msra.gmra.mrb[8].mxu1 %vm172_vm2, %v230_v2  ;;  %v510_v10 = vpop.permute.xlu1 %509 }
 0x4a7   :  { %1664 = vmatpush3.bf16.xpose.msra.mxu1 %v289_v3  ;;  %1665 = vmatprep.mubr.msk.bf16.mxu1 %vm1907_vm1, %v1906_v15 }
 0x4a8   :  { %1675 = vmatprep.subr.bf16.mxu1 %v1906_v15 }
 0x4ae   :  { %1666 = vmatmul.mubr.msk.bf16.vlgmr.msra.gmra.mrb[12].mxu1 %vm172_vm2, %v282_v5 }
 0x4af   :  { %1676 = vmatpush3.bf16.xpose.msra.mxu1 %v407_v6  ;;  %1677 = vmatprep.mubr.msk.bf16.mxu1 %vm1907_vm1, %v1906_v15 }
 0x4b0   :  { %1687 = vmatprep.subr.bf16.mxu1 %v1906_v15 }
 0x4b6   :  { %1678 = vmatmul.mubr.msk.bf16.vlgmr.msra.gmra.mrb[16].mxu1 %vm172_vm2, %v400_v8 }
 0x4b7   :  { %1688 = vmatpush3.bf16.xpose.msra.mxu1 %v517_v9  ;;  %1689 = vmatprep.mubr.msk.bf16.mxu1 %vm1907_vm1, %v1906_v15  ;;  %v1822_v9 = vld [vmem:[%s2336_s6 + $0x8] sm:$0xff]  }
 0x4b8   :  { %1699 = vmatprep.subr.bf16.mxu1 %v1906_v15 }
 0x4be   :  { %1690 = vmatmul.mubr.msk.bf16.vlgmr.msra.gmra.mrb[20].mxu1 %vm172_vm2, %v510_v10 }
 0x4bf   :  { %1701 = vmatprep.mubr.msk.bf16.mxu1 %vm1907_vm1, %v1906_v15  ;;  %1700 = vmatpush3.bf16.msra.mxu1 %v1822_v9 }
 0x4c0   :  { %1711 = vmatprep.subr.bf16.mxu1 %v1906_v15 }
 0x579   :  { %v2091_v11 = vpop.f32.mrb[8].mxu1 }
 0x57a   :  { %v1661_v12 = vpop.f32.mrb[9].mxu1 }
 0x57b   :  { %v277_v13 = vpop.f32.mrb[10].mxu1 }
 0x57c   :  { %v1662_v14 = vpop.f32.mrb[11].mxu1 }
 0x581   :  { %v325_v16 = vpop.f32.mrb[12].mxu1 }
 0x582   :  { %v326_v17 = vadd.f32 %v325_v16, %v2061_v46  ;;  %v1667_v18 = vpop.f32.mrb[13].mxu1 }
 0x583   :  { %v328_v19 = vpop.f32.mrb[14].mxu1 }
 0x584   :  { %v1668_v20 = vpop.f32.mrb[15].mxu1  ;;  %v331_v21 = vsel %vm172_vm2, %v326_v17, -inf }
 0x585   :  { %332 = vmax.xlane.f32.xlu0 %v331_v21 }
 0x589   :  { %v443_v22 = vpop.f32.mrb[16].mxu1 }
 0x58a   :  { %v444_v23 = vadd.f32 %v443_v22, %v2061_v46  ;;  %v1679_v24 = vpop.f32.mrb[17].mxu1 }
 0x58b   :  { %v446_v25 = vpop.f32.mrb[18].mxu1 }
 0x58c   :  { %v1680_v26 = vpop.f32.mrb[19].mxu1  ;;  %v449_v27 = vsel %vm172_vm2, %v444_v23, -inf }
 0x58d   :  { %450 = vmax.xlane.f32.xlu1 %v449_v27 }
 0x591   :  { %v553_v28 = vpop.f32.mrb[20].mxu1 }
 0x592   :  { %v554_v29 = vadd.f32 %v553_v28, %v2061_v46  ;;  %v1691_v30 = vpop.f32.mrb[21].mxu1 }
 0x593   :  { %v556_v31 = vpop.f32.mrb[22].mxu1 }
 0x594   :  { %v1692_v32 = vpop.f32.mrb[23].mxu1  ;;  %v559_v33 = vsel %vm172_vm2, %v554_v29, -inf }
 0x595   :  { %560 = vmax.xlane.f32.xlu0 %v559_v33 }
 0x59e   :  { %461 = vrot.lane.b32.xlu1 %v2041_v39, %s1916_s15 }
 0x612   :  { %v333_v34 = vpop.xlane.xlu0 %332 }
 0x613   :  { %v334_v35 = vsub.f32 %v326_v17, %v333_v34 }
 0x615   :  { %v335_v36 = vmul.f32 1.442695, %v334_v35 }
 0x617   :  { %1842 = vpow2.f32 %v335_v36 }
 0x61a   :  { %v451_v37 = vpop.xlane.xlu1 %450 }
 0x61b   :  { %v452_v38 = vsub.f32 %v444_v23, %v451_v37 }
 0x61d   :  { %v453_v41 = vmul.f32 1.442695, %v452_v38 }
 0x61f   :  { %1844 = vpow2.f32 %v453_v41 }
 0x621   :  { %v1843_v42 = vpop.eup %1842 }
 0x622   :  { %v561_v43 = vpop.xlane.xlu0 %560  ;;  %v337_v44 = vsel %vm172_vm2, %v1843_v42, 0.0 }
 0x623   :  { %v562_v45 = vsub.f32 %v554_v29, %v561_v43  ;;  %338 = vadd.xlane.f32.xlu0 %v337_v44 }
 0x625   :  { %v563_v47 = vmul.f32 1.442695, %v562_v45 }
 0x627   :  { %1846 = vpow2.f32 %v563_v47 }
 0x629   :  { %v1845_v48 = vpop.eup %1844 }
 0x62a   :  { %v455_v49 = vsel %vm172_vm2, %v1845_v48, 0.0 }
 0x62b   :  { %456 = vadd.xlane.f32.xlu0 %v455_v49 }
 0x631   :  { %v1847_v50 = vpop.eup %1846 }
 0x632   :  { %v565_v51 = vsel %vm172_vm2, %v1847_v50, 0.0 }
 0x633   :  { %566 = vadd.xlane.f32.xlu1 %v565_v51 }
 0x641   :  { %343 = vrot.lane.b32.xlu0 %v2041_v39, %s1917_s16 }
 0x644   :  { %571 = vrot.lane.b32.xlu1 %v2041_v39, %s1918_s0  ;;  %v462_v39 = vpop.permute.xlu1 %461 }
 0x645   :  { %731 = vrot.lane.b32.xlu0 %v2109_v53, %s1908_s2  ;;  %v467_v62 = vsel %vm236_vm3, %v462_v39, 0 }
 0x649   :  { %840 = vrot.lane.b32.xlu0 %v2115_v54, %s1913_s1 }
 0x64d   :  { %956 = vrot.lane.b32.xlu0 %v2115_v54, %s1914_s29 }
 0x651   :  { %1066 = vrot.lane.b32.xlu0 %v2115_v54, %s1915_s30 }
 0x6b0   :  { %v339_v40 = vpop.xlane.xlu0 %338 }
 0x6b1   :  { %1848 = vrcp.f32 %v339_v40 }
 0x6b8   :  { %v457_v55 = vpop.xlane.xlu0 %456 }
 0x6b9   :  { %1850 = vrcp.f32 %v457_v55 }
 0x6bb   :  { %v1849_v56 = vpop.eup %1848 }
 0x6bc   :  { %v344_v57 = vpop.permute.xlu0 %343  ;;  %v341_v58 = vmul.f32 %v1849_v56, %v1843_v42 }
 0x6bd   :  { %v349_v59 = vsel %vm236_vm3, %v344_v57, 0 }
 0x6be   :  { %1670 = vmatpush3.bf16.msra.mxu0 %v349_v59  ;;  %v342_v60 = vpack.c.bf16 %v341_v58, %v341_v58 }
 0x6bf   :  { %1681 = vmatprep.subr.bf16.mxu0 %v1906_v15 }
 0x6c0   :  { %v567_v61 = vpop.xlane.xlu1 %566  ;;  %v732_v25 = vpop.permute.xlu0 %731 }
 0x6c1   :  { %1852 = vrcp.f32 %v567_v61  ;;  %1672 = vmatmul.mubr.msk.bf16.vlgmr.msra.gmra.mrb[0].mxu0 %vm172_vm2, %v342_v60  ;;  %v737_v28 = vsel %vm172_vm2, %v732_v25, 0 }
 0x6c2   :  { %1682 = vmatpush3.bf16.msra.mxu0 %v467_v62  ;;  %1683 = vmatprep.mubr.msk.bf16.mxu0 %vm1907_vm1, %v1906_v15 }
 0x6c3   :  { %v1851_v63 = vpop.eup %1850  ;;  %1693 = vmatprep.subr.bf16.mxu0 %v1906_v15 }
 0x6c4   :  { %v459_v2 = vmul.f32 %v1851_v63, %v1845_v48  ;;  %v572_v3 = vpop.permute.xlu1 %571  ;;  %v841_v32 = vpop.permute.xlu0 %840 }
 0x6c5   :  { %v577_v5 = vsel %vm236_vm3, %v572_v3, 0 }
 0x6c6   :  { %v460_v4 = vpack.c.bf16 %v459_v2, %v459_v2 }
 0x6c8   :  { %v957_v35 = vpop.permute.xlu0 %956 }
 0x6c9   :  { %1684 = vmatmul.mubr.msk.bf16.vlgmr.msra.gmra.mrb[4].mxu0 %vm172_vm2, %v460_v4 }
 0x6ca   :  { %1694 = vmatpush3.bf16.msra.mxu0 %v577_v5  ;;  %1695 = vmatprep.mubr.msk.bf16.mxu0 %vm1907_vm1, %v1906_v15 }
 0x6cb   :  { %v1853_v6 = vpop.eup %1852  ;;  %1705 = vmatprep.subr.bf16.mxu0 %v1906_v15 }
 0x6cc   :  { %v569_v7 = vmul.f32 %v1853_v6, %v1847_v50  ;;  %v1067_v37 = vpop.permute.xlu0 %1066 }
 0x6ce   :  { %v570_v8 = vpack.c.bf16 %v569_v7, %v569_v7 }
 0x6d1   :  { %1696 = vmatmul.mubr.msk.bf16.vlgmr.msra.gmra.mrb[8].mxu0 %vm172_vm2, %v570_v8 }
 0x6d2   :  { %1707 = vmatprep.mubr.msk.bf16.mxu0 %vm1907_vm1, %v1906_v15 }
 0x794   :  { %v2142_v10 = vpop.f32.mrb[0].mxu0 }
 0x795   :  { %v1673_v12 = vpop.f32.mrb[1].mxu0 }
 0x796   :  { %v388_v13 = vpop.f32.mrb[2].mxu0 }
 0x797   :  { %v1674_v14 = vpop.f32.mrb[3].mxu0 }
 0x79c   :  { %v503_v16 = vpop.f32.mrb[4].mxu0 }
 0x79d   :  { %v1685_v17 = vpop.f32.mrb[5].mxu0 }
 0x79e   :  { %v506_v18 = vpop.f32.mrb[6].mxu0 }
 0x79f   :  { %v1686_v19 = vpop.f32.mrb[7].mxu0  ;;  %v2196_v18 = vld [vmem:[%s2336_s6] sm:$0xff]  }
 0x7a0   :  { %1706 = vmatpush3.bf16.msra.mxu0 %v2196_v18 }
 0x7a1   :  { %1717 = vmatprep.subr.bf16.mxu0 %v1906_v15 }
 0x7a4   :  { %v613_v20 = vpop.f32.mrb[8].mxu0 }
 0x7a5   :  { %620 = vrot.lane.b32.xlu1 %v613_v20, %s1919_s19  ;;  %v1697_v21 = vpop.f32.mrb[9].mxu0 }
 0x7a6   :  { %v616_v22 = vpop.f32.mrb[10].mxu0 }
 0x7a7   :  { %v1698_v23 = vpop.f32.mrb[11].mxu0 }
 0x7a9   :  { %842 = vrot.lane.b32.xlu1 %v2109_v53, %s1909_s3 }
 0x7ad   :  { %958 = vrot.lane.b32.xlu1 %v2109_v53, %s1910_s25 }
 0x7b1   :  { %1068 = vrot.lane.b32.xlu1 %v2109_v53, %s1911_s5 }
 0x817   :  { %v621_v24 = vpop.permute.xlu1 %620 }
 0x818   :  { %v623_v26 = vsel %vm172_vm2, %v503_v16, %v621_v24 }
 0x819   :  { %v624_v27 = vpack.c.bf16 %v623_v26, %v623_v26 }
 0x81b   :  { %1702 = vmatmul.mubr.msk.bf16.vlgmr.msra.gmra.mrb[24].mxu1 %vm634_vm4, %v624_v27  ;;  %v843_v29 = vpop.permute.xlu1 %842 }
 0x81c   :  { %1712 = vmatpush3.bf16.xpose.msra.mxu1 %v737_v28  ;;  %1713 = vmatprep.mubr.msk.bf16.mxu1 %vm1907_vm1, %v1906_v15  ;;  %v848_v30 = vsel %vm172_vm2, %v843_v29, 0 }
 0x81d   :  { %1723 = vmatprep.subr.bf16.mxu1 %v1906_v15 }
 0x81f   :  { %v959_v31 = vpop.permute.xlu1 %958 }
 0x820   :  { %v964_v33 = vsel %vm172_vm2, %v959_v31, 0 }
 0x823   :  { %1714 = vmatmul.mubr.msk.bf16.vlgmr.msra.gmra.mrb[28].mxu1 %vm172_vm2, %v2115_v54  ;;  %v1069_v34 = vpop.permute.xlu1 %1068 }
 0x824   :  { %1724 = vmatpush3.bf16.xpose.msra.mxu1 %v848_v30  ;;  %1725 = vmatprep.mubr.msk.bf16.mxu1 %vm1907_vm1, %v1906_v15  ;;  %v1074_v36 = vsel %vm172_vm2, %v1069_v34, 0 }
 0x825   :  { %1735 = vmatprep.subr.bf16.mxu1 %v1906_v15 }
 0x82b   :  { %1726 = vmatmul.mubr.msk.bf16.vlgmr.msra.gmra.mrb[32].mxu1 %vm172_vm2, %v841_v32 }
 0x82c   :  { %1736 = vmatpush3.bf16.xpose.msra.mxu1 %v964_v33  ;;  %1737 = vmatprep.mubr.msk.bf16.mxu1 %vm1907_vm1, %v1906_v15 }
 0x82d   :  { %1747 = vmatprep.subr.bf16.mxu1 %v1906_v15 }
 0x833   :  { %1738 = vmatmul.mubr.msk.bf16.vlgmr.msra.gmra.mrb[36].mxu1 %vm172_vm2, %v957_v35 }
 0x834   :  { %1748 = vmatpush3.bf16.xpose.msra.mxu1 %v1074_v36  ;;  %1749 = vmatprep.mubr.msk.bf16.mxu1 %vm1907_vm1, %v1906_v15 }
 0x835   :  { %1759 = vmatprep.subr.bf16.mxu1 %v1906_v15 }
 0x83b   :  { %1750 = vmatmul.mubr.msk.bf16.vlgmr.msra.gmra.mrb[40].mxu1 %vm172_vm2, %v1067_v37 }
 0x83c   :  { %1760 = vmatpush3.bf16.msra.mxu1 %v1822_v9  ;;  %1761 = vmatprep.mubr.msk.bf16.mxu1 %vm1907_vm1, %v1906_v15 }
 0x83d   :  { %1771 = vmatprep.subr.bf16.mxu1 %v1906_v15 }
 0x8ee   :  { %v2177_v38 = vpop.f32.mrb[24].mxu1 }
 0x8ef   :  { %v1703_v41 = vpop.f32.mrb[25].mxu1 }
 0x8f0   :  { %v675_v42 = vpop.f32.mrb[26].mxu1 }
 0x8f1   :  { %v1704_v43 = vpop.f32.mrb[27].mxu1 }
 0x8f6   :  { %v773_v44 = vpop.f32.mrb[28].mxu1 }
 0x8f7   :  { %v774_v45 = vadd.f32 %v773_v44, %v2061_v46  ;;  %v1715_v47 = vpop.f32.mrb[29].mxu1 }
 0x8f8   :  { %v776_v48 = vpop.f32.mrb[30].mxu1 }
 0x8f9   :  { %v1716_v49 = vpop.f32.mrb[31].mxu1  ;;  %v779_v50 = vsel %vm172_vm2, %v774_v45, -inf }
 0x8fa   :  { %780 = vmax.xlane.f32.xlu1 %v779_v50 }
 0x8fe   :  { %v884_v51 = vpop.f32.mrb[32].mxu1 }
 0x8ff   :  { %v885_v52 = vadd.f32 %v884_v51, %v2061_v46  ;;  %v1727_v54 = vpop.f32.mrb[33].mxu1 }
 0x900   :  { %v887_v40 = vpop.f32.mrb[34].mxu1 }
 0x901   :  { %v1728_v55 = vpop.f32.mrb[35].mxu1  ;;  %v890_v56 = vsel %vm172_vm2, %v885_v52, -inf }
 0x902   :  { %891 = vmax.xlane.f32.xlu0 %v890_v56 }
 0x906   :  { %v1000_v39 = vpop.f32.mrb[36].mxu1 }
 0x907   :  { %v1001_v57 = vadd.f32 %v1000_v39, %v2061_v46  ;;  %v1739_v58 = vpop.f32.mrb[37].mxu1 }
 0x908   :  { %v1003_v59 = vpop.f32.mrb[38].mxu1 }
 0x909   :  { %v1740_v60 = vpop.f32.mrb[39].mxu1  ;;  %v1006_v61 = vsel %vm172_vm2, %v1001_v57, -inf }
 0x90a   :  { %1007 = vmax.xlane.f32.xlu0 %v1006_v61 }
 0x90e   :  { %v1110_v62 = vpop.f32.mrb[40].mxu1 }
 0x90f   :  { %v1111_v63 = vadd.f32 %v1110_v62, %v2061_v46  ;;  %v1751_v2 = vpop.f32.mrb[41].mxu1 }
 0x910   :  { %v1113_v3 = vpop.f32.mrb[42].mxu1 }
 0x911   :  { %v1752_v4 = vpop.f32.mrb[43].mxu1  ;;  %v1116_v5 = vsel %vm172_vm2, %v1111_v63, -inf }
 0x912   :  { %1117 = vmax.xlane.f32.xlu0 %v1116_v5 }
 0x987   :  { %v781_v6 = vpop.xlane.xlu1 %780 }
 0x988   :  { %v782_v7 = vsub.f32 %v774_v45, %v781_v6 }
 0x98a   :  { %v783_v8 = vmul.f32 1.442695, %v782_v7 }
 0x98c   :  { %1854 = vpow2.f32 %v783_v8 }
 0x98f   :  { %v892_v9 = vpop.xlane.xlu0 %891 }
 0x990   :  { %v893_v12 = vsub.f32 %v885_v52, %v892_v9 }
 0x992   :  { %v894_v13 = vmul.f32 1.442695, %v893_v12 }
 0x994   :  { %1856 = vpow2.f32 %v894_v13 }
 0x996   :  { %v1855_v14 = vpop.eup %1854 }
 0x997   :  { %v785_v16 = vsel %vm172_vm2, %v1855_v14, 0.0  ;;  %v1008_v19 = vpop.xlane.xlu0 %1007 }
 0x998   :  { %786 = vadd.xlane.f32.xlu1 %v785_v16  ;;  %v1009_v20 = vsub.f32 %v1001_v57, %v1008_v19  ;;  %v1570_v57 = vld [vmem:[%s2337_s7] ss:$0 sm:$0xff]  ;;  %s1920_s7 = smov [#allocation2]  }
 0x999   :  { %s1529_s22 = sshll.u32 %s1920_s7, 4  ;;  %s1530_s22 = int_to_ptr.vmem [resolvable:$true] %s1529_s22 }
 0x99a   :  { %v1010_v22 = vmul.f32 1.442695, %v1009_v20  ;;  %s1882_s23 = scalar_lea.vmem %s1530_s22, 256  ;;  %p1887_p1 = scmp.lt.s32.totalorder %s1530_s22, %s1530_s22 }
 0x99b   :  { %p1883_p0 = scmp.ne.s32.totalorder %s1530_s22, %s1882_s23  ;;  %p1888_p2 = scmp.lt.s32.totalorder %s1882_s23, %s1882_s23 }
 0x99c   :  { %1858 = vpow2.f32 %v1010_v22 }
 0x99d   :  { %p1889_p3 = por %p1888_p2, %p1887_p1 }
 0x99e   :  { %v1857_v17 = vpop.eup %1856 }
 0x99f   :  { %v896_v46 = vsel %vm172_vm2, %v1857_v17, 0.0  ;;  %v1118_v21 = vpop.xlane.xlu0 %1117  ;;  %p1890_p4 = pnand %p1889_p3, %p1883_p0 }
 0x9a0   :  { %897 = vadd.xlane.f32.xlu0 %v896_v46  ;;  %v1119_v23 = vsub.f32 %v1111_v63, %v1118_v21 }
 0x9a2   :  { %v1120_v24 = vmul.f32 1.442695, %v1119_v23 }
 0x9a4   :  { %1860 = vpow2.f32 %v1120_v24 }
 0x9a6   :  { %v1859_v25 = vpop.eup %1858 }
 0x9a7   :  { %v1012_v26 = vsel %vm172_vm2, %v1859_v25, 0.0 }
 0x9a9   :  { %791 = vrot.lane.b32.xlu1 %v2109_v53, %s1912_s28 }
 0x9ad   :  { %902 = vrot.lane.b32.xlu1 %v2109_v53, %s1917_s16 }
 0x9ae   :  { %v1861_v27 = vpop.eup %1860 }
 0x9af   :  { %v1122_v28 = vsel %vm172_vm2, %v1861_v27, 0.0 }
 0x9b6   :  { %392 = vrot.lane.b32.xlu0 %v2142_v10, %s1919_s19 }
 0x9ba   :  { %1018 = vrot.lane.b32.xlu0 %v2109_v53, %s1916_s15 }
 0x9d1   :  { %1013 = vadd.xlane.f32.xlu1 %v1012_v26 }
 0x9d5   :  { %1123 = vadd.xlane.f32.xlu1 %v1122_v28 }
 0x9e6   :  { %1128 = vrot.lane.b32.xlu1 %v2109_v53, %s1918_s0 }
 0xa25   :  { %v787_v10 = vpop.xlane.xlu1 %786 }
 0xa26   :  { %1862 = vrcp.f32 %v787_v10 }
 0xa29   :  { %v792_v31 = vpop.permute.xlu1 %791 }
 0xa2a   :  { %v797_v35 = vsel %vm236_vm3, %v792_v31, 0 }
 0xa2d   :  { %v898_v29 = vpop.xlane.xlu0 %897  ;;  %v903_v36 = vpop.permute.xlu1 %902 }
 0xa2e   :  { %1864 = vrcp.f32 %v898_v29  ;;  %v908_v42 = vsel %vm236_vm3, %v903_v36, 0 }
 0xa30   :  { %v1863_v34 = vpop.eup %1862 }
 0xa31   :  { %v393_v30 = vpop.permute.xlu0 %392  ;;  %v789_v53 = vmul.f32 %v1863_v34, %v1855_v14 }
 0xa32   :  { %v395_v32 = vsel %vm172_vm2, %v2091_v11, %v393_v30 }
 0xa33   :  { %v396_v33 = vpack.c.bf16 %v395_v32, %v395_v32  ;;  %v790_v37 = vpack.c.bf16 %v789_v53, %v789_v53 }
 0xa35   :  { %1708 = vmatmul.mubr.msk.bf16.vlgmr.msra.gmra.mrb[12].mxu0 %vm634_vm4, %v396_v33  ;;  %v1019_v43 = vpop.permute.xlu0 %1018 }
 0xa36   :  { %1718 = vmatpush3.bf16.msra.mxu0 %v797_v35  ;;  %1719 = vmatprep.mubr.msk.bf16.mxu0 %vm1907_vm1, %v1906_v15  ;;  %v1024_v45 = vsel %vm236_vm3, %v1019_v43, 0 }
 0xa37   :  { %1729 = vmatprep.subr.bf16.mxu0 %v1906_v15 }
 0xa38   :  { %v1865_v41 = vpop.eup %1864 }
 0xa39   :  { %v900_v11 = vmul.f32 %v1865_v41, %v1857_v17 }
 0xa3b   :  { %v901_v44 = vpack.c.bf16 %v900_v11, %v900_v11 }
 0xa3d   :  { %1720 = vmatmul.mubr.msk.bf16.vlgmr.msra.gmra.mrb[16].mxu0 %vm172_vm2, %v790_v37 }
 0xa3e   :  { %1730 = vmatpush3.bf16.msra.mxu0 %v908_v42  ;;  %1731 = vmatprep.mubr.msk.bf16.mxu0 %vm1907_vm1, %v1906_v15 }
 0xa3f   :  { %1741 = vmatprep.subr.bf16.mxu0 %v1906_v15 }
 0xa45   :  { %1732 = vmatmul.mubr.msk.bf16.vlgmr.msra.gmra.mrb[20].mxu0 %vm172_vm2, %v901_v44 }
 0xa46   :  { %1742 = vmatpush3.bf16.msra.mxu0 %v1024_v45  ;;  %1743 = vmatprep.mubr.msk.bf16.mxu0 %vm1907_vm1, %v1906_v15 }
 0xa47   :  { %1753 = vmatprep.subr.bf16.mxu0 %v1906_v15 }
 0xa5e   :  { %v1014_v47 = vpop.xlane.xlu1 %1013 }
 0xa5f   :  { %1866 = vrcp.f32 %v1014_v47 }
 0xa62   :  { %v1124_v48 = vpop.xlane.xlu1 %1123 }
 0xa63   :  { %1868 = vrcp.f32 %v1124_v48 }
 0xa66   :  { %v1129_v51 = vpop.permute.xlu1 %1128 }
 0xa67   :  { %v1134_v40 = vsel %vm236_vm3, %v1129_v51, 0 }
 0xa69   :  { %v1867_v49 = vpop.eup %1866 }
 0xa6a   :  { %v1016_v50 = vmul.f32 %v1867_v49, %v1859_v25 }
 0xa6c   :  { %v1017_v52 = vpack.c.bf16 %v1016_v50, %v1016_v50  ;;  %v1825_v50 = vld [vmem:[%s2340_s10 + $0x8] sm:$0xff]  }
 0xa6d   :  { %v1869_v54 = vpop.eup %1868 }
 0xa6e   :  { %1744 = vmatmul.mubr.msk.bf16.vlgmr.msra.gmra.mrb[24].mxu0 %vm172_vm2, %v1017_v52  ;;  %v1126_v55 = vmul.f32 %v1869_v54, %v1861_v27 }
 0xa6f   :  { %1754 = vmatpush3.bf16.msra.mxu0 %v1134_v40  ;;  %1755 = vmatprep.mubr.msk.bf16.mxu0 %vm1907_vm1, %v1906_v15 }
 0xa70   :  { %1765 = vmatprep.subr.bf16.mxu0 %v1906_v15  ;;  %v1127_v56 = vpack.c.bf16 %v1126_v55, %v1126_v55 }
 0xa76   :  { %1756 = vmatmul.mubr.msk.bf16.vlgmr.msra.gmra.mrb[28].mxu0 %vm172_vm2, %v1127_v56 }
 0xa77   :  { %1766 = vmatpush3.bf16.msra.mxu0 %v2196_v18  ;;  %1767 = vmatprep.mubr.msk.bf16.mxu0 %vm1907_vm1, %v1906_v15 }
 0xa78   :  { %1779 = vmatprep.subr.bf16.mxu0 %v1906_v15 }
 0xb08   :  { %v721_v39 = vpop.f32.mrb[12].mxu0 }
 0xb09   :  { %v722_v58 = vadd.f32 %v721_v39, %v2177_v38  ;;  %v1709_v59 = vpop.f32.mrb[13].mxu0 }
 0xb0a   :  { %v724_v60 = vpop.f32.mrb[14].mxu0 }
 0xb0b   :  { %v1275_v61 = vadd.f32 %v1570_v57, %v722_v58  ;;  %v1710_v62 = vpop.f32.mrb[15].mxu0  ;;  %v1571_v58 = vld [vmem:[%s2338_s8] ss:$0 sm:$0xff] }
 0xb0c   :  { %v1572_v62 = vld [vmem:[%s2339_s9] ss:$0 sm:$0xff] }
 0xb0d   :  { %v2240_v63 = vadd.f32 %v1275_v61, %v2000_v0 }
 0xb0f   :  { %v1281_v2 = vsel %vm53_vm0, %v2240_v63, 0.0 }
 0xb10   :  { %1282 = vadd.xlane.f32.xlu1 %v1281_v2  ;;  %v833_v3 = vpop.f32.mrb[16].mxu0 }
 0xb11   :  { %v1721_v4 = vpop.f32.mrb[17].mxu0 }
 0xb12   :  { %v836_v5 = vpop.f32.mrb[18].mxu0 }
 0xb13   :  { %v1722_v6 = vpop.f32.mrb[19].mxu0 }
 0xb14   :  { %v1826_v6 = vld [vmem:[%s2342_s12] sm:$0xff]  }
 0xb18   :  { %v944_v7 = vpop.f32.mrb[20].mxu0 }
 0xb19   :  { %v1733_v8 = vpop.f32.mrb[21].mxu0 }
 0xb1a   :  { %v947_v9 = vpop.f32.mrb[22].mxu0  ;;  %v1828_v8 = vld [vmem:[%s2342_s12 + $0x10] sm:$0xff]  }
 0xb1b   :  { %v1734_v12 = vpop.f32.mrb[23].mxu0  ;;  %v1829_v9 = vld [vmem:[%s2342_s12 + $0x18] sm:$0xff]  }
 0xb1c   :  { %v1830_v12 = vld [vmem:[%s2342_s12 + $0x20] sm:$0xff]  }
 0xb41   :  { %v1060_v38 = vpop.f32.mrb[24].mxu0 }
 0xb42   :  { %v1745_v13 = vpop.f32.mrb[25].mxu0 }
 0xb43   :  { %v1063_v14 = vpop.f32.mrb[26].mxu0  ;;  %v1832_v13 = vld [vmem:[%s2342_s12 + $0x30] sm:$0xff]  }
 0xb44   :  { %v1746_v16 = vpop.f32.mrb[27].mxu0  ;;  %v1833_v14 = vld [vmem:[%s2342_s12 + $0x38] sm:$0xff]  }
 0xb45   :  { %v1573_v16 = vld [vmem:[%s2341_s11] ss:$0 sm:$0xff] }
 0xb49   :  { %v1170_v17 = vpop.f32.mrb[28].mxu0 }
 0xb4a   :  { %v1815_v46 = vpack.i.bf16 %v1170_v17, %v944_v7  ;;  %v1757_v0 = vpop.f32.mrb[29].mxu0  ;;  %v1827_v7 = vld [vmem:[%s2342_s12 + $0x8] sm:$0xff]  }
 0xb4b   :  { %v1173_v18 = vpop.f32.mrb[30].mxu0 }
 0xb4c   :  { %1816 = vrot.lane.b32.xlu0 %v1815_v46, %s1919_s19  ;;  %v1758_v19 = vpop.f32.mrb[31].mxu0 }
 0xb9d   :  { %v1283_v27 = vpop.xlane.xlu1 %1282 }
 0xb9e   :  { %v1287_v28 = vmul.f32 0.03125, %v1283_v27 }
 0xba0   :  { %v1289_v35 = vsub.f32 %v2240_v63, %v1287_v28 }
 0xba2   :  { %v1291_v11 = vmul.f32 %v1289_v35, %v1289_v35 }
 0xba4   :  { %v1293_v43 = vsel %vm53_vm0, %v1291_v11, 0.0 }
 0xbbe   :  { %v1817_v20 = vpop.permute.xlu0 %1816 }
 0xbbf   :  { %v1819_v21 = vunpack.i.h.bf16 %v1817_v20  ;;  %v1818_v22 = vunpack.i.l.bf16 %v1817_v20 }
 0xbc1   :  { %v1180_v23 = vsel %vm172_vm2, %v1060_v38, %v1819_v21  ;;  %v954_v24 = vsel %vm172_vm2, %v833_v3, %v1818_v22  ;;  %v1831_v38 = vld [vmem:[%s2342_s12 + $0x28] sm:$0xff]  }
 0xbc2   :  { %v1181_v25 = vpack.c.bf16 %v1180_v23, %v1180_v23  ;;  %v955_v26 = vpack.c.bf16 %v954_v24, %v954_v24 }
 0xbc4   :  { %1762 = vmatmul.mubr.msk.bf16.vlgmr.msra.gmra.mrb[44].mxu1 %vm634_vm4, %v1181_v25  ;;  %1768 = vmatmul.mubr.msk.bf16.vlgmr.msra.gmra.mrb[32].mxu0 %vm634_vm4, %v955_v26 }
 0xbc5   :  { %1775 = vmatprep.mubr.msk.bf16.mxu1 %vm1907_vm1, %v1906_v15  ;;  %1795 = vmatprep.mubr.msk.bf16.mxu0 %vm1907_vm1, %v1906_v15 }
 0xbc6   :  { %1780 = vmatpush3.bf16.msra.mxu0 %v1826_v6 }
 0xbc7   :  { %1781 = vmatprep.subr.bf16.mxu0 %v1906_v15 }
 0xbca   :  { %1782 = vmatpush3.bf16.msra.mxu0 %v1827_v7 }
 0xbcb   :  { %1783 = vmatprep.subr.bf16.mxu0 %v1906_v15 }
 0xbce   :  { %1784 = vmatpush3.bf16.msra.mxu0 %v1828_v8 }
 0xbcf   :  { %1785 = vmatprep.subr.bf16.mxu0 %v1906_v15 }
 0xbd2   :  { %1786 = vmatpush3.bf16.msra.mxu0 %v1829_v9 }
 0xbd3   :  { %1787 = vmatprep.subr.bf16.mxu0 %v1906_v15 }
 0xbd6   :  { %1788 = vmatpush3.bf16.msra.mxu0 %v1830_v12 }
 0xbd7   :  { %1789 = vmatprep.subr.bf16.mxu0 %v1906_v15 }
 0xbda   :  { %1790 = vmatpush3.bf16.msra.mxu0 %v1831_v38 }
 0xbdb   :  { %1791 = vmatprep.subr.bf16.mxu0 %v1906_v15 }
 0xbde   :  { %1792 = vmatpush3.bf16.msra.mxu0 %v1832_v13 }
 0xbdf   :  { %1793 = vmatprep.subr.bf16.mxu0 %v1906_v15 }
 0xbe2   :  { %1794 = vmatpush3.bf16.msra.mxu0 %v1833_v14 }
 0xc97   :  { %v1219_v10 = vpop.f32.mrb[44].mxu1  ;;  %v1262_v29 = vpop.f32.mrb[32].mxu0 }
 0xc98   :  { %v1263_v30 = vadd.f32 %v1262_v29, %v1219_v10  ;;  %v1763_v31 = vpop.f32.mrb[45].mxu1  ;;  %v1769_v32 = vpop.f32.mrb[33].mxu0 }
 0xc99   :  { %v1222_v33 = vpop.f32.mrb[46].mxu1  ;;  %v1265_v34 = vpop.f32.mrb[34].mxu0  ;;  %v1579_v32 = vld [vmem:[%s2343_s13] ss:$0 sm:$0xff] }
 0xc9a   :  { %v1276_v53 = vadd.f32 %v1570_v57, %v1263_v30  ;;  %v1764_v36 = vpop.f32.mrb[47].mxu1  ;;  %v1770_v37 = vpop.f32.mrb[35].mxu0 }
 0xc9c   :  { %v2255_v41 = vadd.f32 %v1276_v53, %v2005_v1  ;;  %v1824_v1 = vld [vmem:[%s2340_s10] sm:$0xff]  }
 0xc9d   :  { %1772 = vmatpush3.bf16.msra.mxu1 %v1824_v1 }
 0xc9e   :  { %v1284_v42 = vsel %vm53_vm0, %v2255_v41, 0.0  ;;  %1773 = vmatprep.subr.bf16.mxu1 %v1906_v15 }
 0xc9f   :  { %1285 = vadd.xlane.f32.xlu0 %v1284_v42 }
 0xca1   :  { %1774 = vmatpush3.bf16.msra.mxu1 %v1825_v50 }
 0xca3   :  { %1294 = vadd.xlane.f32.xlu0 %v1293_v43 }
 0xd2c   :  { %v1286_v44 = vpop.xlane.xlu0 %1285 }
 0xd2d   :  { %v1288_v45 = vmul.f32 0.03125, %v1286_v44 }
 0xd2f   :  { %v1290_v47 = vsub.f32 %v2255_v41, %v1288_v45 }
 0xd30   :  { %v1295_v51 = vpop.xlane.xlu0 %1294 }
 0xd31   :  { %v1292_v48 = vmul.f32 %v1290_v47, %v1290_v47  ;;  %v1299_v52 = vmul.f32 0.03125, %v1295_v51 }
 0xd33   :  { %v1296_v49 = vsel %vm53_vm0, %v1292_v48, 0.0  ;;  %v1301_v54 = vadd.f32 1e-05, %v1299_v52 }
 0xd34   :  { %1297 = vadd.xlane.f32.xlu0 %v1296_v49 }
 0xd35   :  { %1870 = vrsqrt.f32 %v1301_v54 }
 0xd3f   :  { %v1871_v39 = vpop.eup %1870 }
 0xd40   :  { %v1305_v57 = vmul.f32 %v1871_v39, %v1289_v35 }
 0xd42   :  { %v1313_v60 = vmul.f32 %v1571_v58, %v1305_v57 }
 0xd44   :  { %v1321_v3 = vadd.f32 %v1572_v62, %v1313_v60 }
 0xdc1   :  { %v1298_v40 = vpop.xlane.xlu0 %1297 }
 0xdc2   :  { %v1300_v55 = vmul.f32 0.03125, %v1298_v40 }
 0xdc4   :  { %v1302_v56 = vadd.f32 1e-05, %v1300_v55 }
 0xdc6   :  { %1872 = vrsqrt.f32 %v1302_v56 }
 0xdd0   :  { %v1873_v59 = vpop.eup %1872 }
 0xdd1   :  { %v1306_v61 = vmul.f32 %v1873_v59, %v1290_v47 }
 0xdd3   :  { %v1314_v2 = vmul.f32 %v1571_v58, %v1306_v61 }
 0xdd5   :  { %v1322_v4 = vadd.f32 %v1572_v62, %v1314_v2 }
 0xdd7   :  { %v1327_v5 = vpack.c.bf16 %v1322_v4, %v1321_v3 }
 0xdd9   :  { %1776 = vmatmul.mubr.msk.bf16.vlgmr.msra.gmra.mrb[48].mxu1 %vm53_vm0, %v1327_v5 }
 0xeac   :  { %v1384_v17 = vpop.f32.mrb[48].mxu1 }
 0xead   :  { %v1385_v46 = vadd.f32 %v1573_v16, %v1384_v17  ;;  %v1777_v0 = vpop.f32.mrb[49].mxu1 }
 0xeae   :  { %v1387_v18 = vpop.f32.mrb[50].mxu1 }
 0xeaf   :  { %v1577_v19 = vmul.f32 -1.702, %v1385_v46  ;;  %v1388_v20 = vadd.f32 %v1573_v16, %v1387_v18  ;;  %v1778_v21 = vpop.f32.mrb[51].mxu1 }
 0xeb1   :  { %v1395_v22 = vmul.f32 1.442695, %v1577_v19  ;;  %v1578_v23 = vmul.f32 -1.702, %v1388_v20 }
 0xeb3   :  { %1874 = vpow2.f32 %v1395_v22  ;;  %v1397_v15 = vmul.f32 1.442695, %v1578_v23 }
 0xeb5   :  { %1876 = vpow2.f32 %v1397_v15 }
 0xebd   :  { %v1875_v24 = vpop.eup %1874 }
 0xebe   :  { %v1399_v25 = vadd.f32 1.0, %v1875_v24 }
 0xebf   :  { %v1877_v26 = vpop.eup %1876 }
 0xec0   :  { %1878 = vrcp.f32 %v1399_v25  ;;  %v1400_v27 = vadd.f32 1.0, %v1877_v26 }
 0xec2   :  { %1880 = vrcp.f32 %v1400_v27 }
 0xeca   :  { %v1879_v28 = vpop.eup %1878 }
 0xecb   :  { %v1405_v29 = vmul.f32 %v1879_v28, %v1385_v46 }
 0xecc   :  { %v1881_v10 = vpop.eup %1880 }
 0xecd   :  { %v1406_v30 = vmul.f32 %v1881_v10, %v1388_v20 }
 0xecf   :  { %v1423_v31 = vpack.c.bf16 %v1406_v30, %v1405_v29 }
 0xed1   :  { %1796 = vmatmul.mubr.bf16.vlgmr.msra.gmra.mrb[36].mxu0 %v1423_v31 }
 0xfa4   :  { %v1513_v33 = vpop.f32.mrb[36].mxu0 }
 0xfa5   :  { %v1514_v34 = vadd.f32 %v1579_v32, %v1513_v33  ;;  %v1797_v35 = vpop.f32.mrb[37].mxu0 }
 0xfa6   :  { %v1516_v53 = vpop.f32.mrb[38].mxu0 }
 0xfa7   :  { %v1520_v36 = vadd.f32 %v1514_v34, %v2240_v63  ;;  %v1517_v37 = vadd.f32 %v1579_v32, %v1516_v53  ;;  %v1798_v42 = vpop.f32.mrb[39].mxu0 }
 0xfa9   :  { %1522 = vst.msk [vmem:[#allocation2] sm:$0xff] %vm53_vm0, %v1520_v36  ;;  %v1521_v11 = vadd.f32 %v1517_v37, %v2255_v41 }
 0xfab   :  { %1523 = vst.msk [vmem:[#allocation2 + $0x8] sm:$0xff] %vm53_vm0, %v1521_v11 }
 0xfac   :  { %1893 = shalt.err (!%p1890_p4)
}
 0xfad   :  { %s1894_s2 = scalar_lea.hbm %s2344_s14, 256 }
 0xfae   :  { %p1895_p5 = scmp.ne.s32.totalorder %s2344_s14, %s1894_s2  ;;  %p1898_p6 = scmp.lt.u32.totalorder %s1894_s2, %s2344_s14 }
 0xfb0   :  { %p1900_p7 = pnand %p1898_p6, %p1895_p5 }
 0xfb2   :  { %1903 = shalt.err (!%p1900_p7)
}
 0xfb3   :  { %s1921_s26 = smov 128  }
 0xfb4   :  { %1535 = dma.vmem_to_hbm [thread:$0]  %s1530_s22, 256, %s2344_s14, [#allocation3], %s1921_s26, %s1921_s26, %s1919_s19  }
 0xfb5   :  { %1904 = dma.done.wait [#allocation3], 256  }
 0xfb6   :  { %1905 = vsyncadd [#allocation3], 4294967040 }
 0xfb7   :  { %1539 = vsyncpa [#allocation3], 1 }

</bundles_post_ra>
